<compile_context>
chip_gen: v5e
topology: v5e:2x2
jax: 0.10.0
libtpu: 0.0.40
codegen_flags: <defaults>
</compile_context>

<pallas_src>
import functools

import jax
import jax.numpy as jnp
from jax.experimental import pallas as pl
from jax.experimental.pallas import tpu as pltpu

# Small, structure-preserving dims (original: attri=1024, noise=512, H=2048, out=2048).
ATTRI_DIM = 256
NOISE_DIM = 128
HIDDEN = 512
OUT_DIM = 384          # deliberately != HIDDEN to exercise the general bias path
BN_EPS = 0.8           # nn.BatchNorm1d(2048, 0.8) -> eps = 0.8
LEAKY_SLOPE = 0.2
BATCH = 32
TILE_B = 16            # batch tile (use 128-256 at production dims)
CHUNK = 128            # streamed weight chunk width (use 256-512 at production dims)


def _leaky_relu(x, slope=LEAKY_SLOPE):
    return jnp.where(x > 0, x, slope * x)


def generator_kernel(attri_ref, noise_ref,
                     w1a_ref, w1b_ref,          # split L1 weight (resident, bf16)
                     w2c_ref, w3c_ref, w4c_ref,  # streamed chunks of L2/L3/L4 (bf16)
                     b1_ref, b2c_ref, b3_ref, b4c_ref,   # biases (b2/b4 chunked), f32
                     out_ref,                    # (TILE_B, CHUNK) output column chunk
                     h1_ref, h2_ref, h3acc_ref, h3_ref,  # VMEM scratch
                     *, n2, k3):
    s = pl.program_id(1)

    # --- step 0 of every batch tile: L1 (fused concat) + init the L3 accumulator ---
    @pl.when(s == 0)
    def _():
        h1 = (jnp.dot(attri_ref[...].astype(jnp.bfloat16), w1a_ref[...],
                      preferred_element_type=jnp.float32)
              + jnp.dot(noise_ref[...].astype(jnp.bfloat16), w1b_ref[...],
                        preferred_element_type=jnp.float32)
              + b1_ref[...])
        h1 = _leaky_relu(h1)                       # Dropout(0.5) = identity in eval
        h1_ref[...] = h1.astype(jnp.bfloat16)
        h3acc_ref[...] = jnp.zeros_like(h3acc_ref)

    # --- phase A (0 <= s < n2): L2 (BN folded), one output-column chunk ---
    @pl.when(s < n2)
    def _():
        c = s
        h2c = (jnp.dot(h1_ref[...], w2c_ref[...], preferred_element_type=jnp.float32)
               + b2c_ref[...])
        h2_ref[c] = h2c.astype(jnp.bfloat16)       # dynamic first-axis store

    # --- phase B (n2 <= s < n2+k3): L3 (BN folded), accumulate over K chunks ---
    @pl.when(jnp.logical_and(s >= n2, s < n2 + k3))
    def _():
        k = s - n2
        h3acc_ref[...] += jnp.dot(h2_ref[k], w3c_ref[...],
                                  preferred_element_type=jnp.float32)

    # finalize L3 on its last K chunk: bias + LeakyReLU, cast for the MXU
    @pl.when(s == n2 + k3 - 1)
    def _():
        h3 = _leaky_relu(h3acc_ref[...] + b3_ref[...])
        h3_ref[...] = h3.astype(jnp.bfloat16)

    # --- phase C (s >= n2+k3): L4, one output-column chunk -> out block ---
    @pl.when(s >= n2 + k3)
    def _():
        o = (jnp.dot(h3_ref[...], w4c_ref[...], preferred_element_type=jnp.float32)
             + b4c_ref[...])
        out_ref[...] = o.astype(out_ref.dtype)


def prepare_params(raw_params):
    """Host-side one-time prep: fold eval-BN into the linears, split w1, cast to bf16."""
    (w1, b1, w2, b2, g2, be2, rm2, rv2,
     w3, b3, g3, be3, rm3, rv3, w4, b4) = raw_params

    scale2 = g2 * jax.lax.rsqrt(rv2 + BN_EPS)                 # (1, H)
    w2f = (w2 * scale2).astype(jnp.bfloat16)
    b2f = ((b2 - rm2) * scale2 + be2).astype(jnp.float32)

    scale3 = g3 * jax.lax.rsqrt(rv3 + BN_EPS)
    w3f = (w3 * scale3).astype(jnp.bfloat16)
    b3f = ((b3 - rm3) * scale3 + be3).astype(jnp.float32)

    w1a = w1[:ATTRI_DIM, :].astype(jnp.bfloat16)              # rows matching attri
    w1b = w1[ATTRI_DIM:, :].astype(jnp.bfloat16)              # rows matching noise

    return (w1a, w1b, w2f, w3f, w4.astype(jnp.bfloat16),
            b1.astype(jnp.float32), b2f, b3f, b4.astype(jnp.float32))


@functools.partial(jax.jit, static_argnames=("tile_b", "chunk"))
def generator_forward(noise, attri, packed, *, tile_b=TILE_B, chunk=CHUNK):
    w1a, w1b, w2f, w3f, w4, b1, b2f, b3f, b4 = packed

    batch = attri.shape[0]
    attri_dim = w1a.shape[0]
    noise_dim = w1b.shape[0]
    hidden = w1a.shape[1]
    out_dim = w4.shape[1]

    tile_b = min(tile_b, batch)
    assert batch % tile_b == 0, "batch must be a multiple of the batch tile"
    assert hidden % chunk == 0 and out_dim % chunk == 0, "chunk must divide H and OUT"

    nb = batch // tile_b
    n2 = hidden // chunk       # L2 output-column chunks
    k3 = hidden // chunk       # L3 K(row) chunks
    n4 = out_dim // chunk      # L4 output-column chunks
    steps = n2 + k3 + n4

    # Advisory cost estimate: lets XLA schedule around this DMA-bound custom call.
    flops = 2 * batch * ((attri_dim + noise_dim) * hidden
                         + 2 * hidden * hidden + hidden * out_dim)
    weight_bytes = 2 * (w1a.size + w1b.size + w2f.size + w3f.size + w4.size)  # bf16
    io_bytes = 4 * (attri.size + noise.size + batch * out_dim)
    cost = pl.CostEstimate(flops=flops, transcendentals=0,
                           bytes_accessed=weight_bytes * nb + io_bytes)

    # Explicit VMEM budget: double-buffered streamed chunks + resident w1 + biases
    # + activation scratch + in/out tiles, with 2x headroom (required at real dims:
    # the default scoped limit is 16 MiB on v5e / 32 MiB on v6e/v7x).
    est = (2 * 2 * 2 * (2 * hidden * chunk + chunk * hidden)       # w2/w3/w4 chunk bufs
           + 2 * 2 * (w1a.size + w1b.size)                         # resident w1 (2 bufs)
           + 2 * 4 * (3 * hidden + out_dim + 2 * chunk)            # biases
           + tile_b * hidden * (2 + 2 + 2 + 4)                     # h1/h2/h3 + f32 acc
           + 2 * 4 * tile_b * (attri_dim + noise_dim + chunk))     # in/out tiles
    vmem_limit = int(min(max(2 * est, 32 * 1024 * 1024), 64 * 1024 * 1024))

    def _c(v, hi):   # clamp a (possibly negative) traced index into [0, hi]
        return jnp.minimum(jnp.maximum(v, 0), hi)

    in_specs = [
        pl.BlockSpec((tile_b, attri_dim), lambda i, s: (i, 0)),              # attri tile
        pl.BlockSpec((tile_b, noise_dim), lambda i, s: (i, 0)),              # noise tile
        pl.BlockSpec((attri_dim, hidden), lambda i, s: (0, 0)),              # w1a resident
        pl.BlockSpec((noise_dim, hidden), lambda i, s: (0, 0)),              # w1b resident
        pl.BlockSpec((hidden, chunk), lambda i, s: (0, _c(s, n2 - 1))),      # w2 col chunk
        pl.BlockSpec((chunk, hidden), lambda i, s: (_c(s - n2, k3 - 1), 0)), # w3 row chunk
        pl.BlockSpec((hidden, chunk),
                     lambda i, s: (0, _c(s - n2 - k3, n4 - 1))),             # w4 col chunk
        pl.BlockSpec((1, hidden), lambda i, s: (0, 0)),                      # b1
        pl.BlockSpec((1, chunk), lambda i, s: (0, _c(s, n2 - 1))),           # b2 chunk
        pl.BlockSpec((1, hidden), lambda i, s: (0, 0)),                      # b3
        pl.BlockSpec((1, chunk), lambda i, s: (0, _c(s - n2 - k3, n4 - 1))), # b4 chunk
    ]
    out_spec = pl.BlockSpec((tile_b, chunk),
                            lambda i, s: (i, _c(s - n2 - k3, n4 - 1)))

    kernel = functools.partial(generator_kernel, n2=n2, k3=k3)

    return pl.pallas_call(
        kernel,
        out_shape=jax.ShapeDtypeStruct((batch, out_dim), jnp.float32),
        grid=(nb, steps),
        in_specs=in_specs,
        out_specs=out_spec,
        scratch_shapes=[
            pltpu.VMEM((tile_b, hidden), jnp.bfloat16),        # h1 (post LeakyReLU)
            pltpu.VMEM((n2, tile_b, chunk), jnp.bfloat16),     # h2 column chunks
            pltpu.VMEM((tile_b, hidden), jnp.float32),         # h3 f32 accumulator
            pltpu.VMEM((tile_b, hidden), jnp.bfloat16),        # h3 (post LeakyReLU)
        ],
        compiler_params=pltpu.CompilerParams(
            dimension_semantics=("parallel", "arbitrary"),     # batch tiles // on v7x TCs
            vmem_limit_bytes=vmem_limit,
        ),
        cost_estimate=cost,
    )(attri, noise, w1a, w1b, w2f, w3f, w4, b1, b2f, b3f, b4)


def init_params(key):
    """Deterministic synthetic parameters mirroring the module's __init__ shapes (f32)."""
    in_dim = ATTRI_DIM + NOISE_DIM
    ks = jax.random.split(key, 12)

    def lin(k, fan_in, fan_out):
        bound = 1.0 / jnp.sqrt(fan_in)
        w = jax.random.uniform(k, (fan_in, fan_out), jnp.float32, -bound, bound)
        b = jax.random.uniform(jax.random.fold_in(k, 1), (1, fan_out),
                               jnp.float32, -bound, bound)
        return w, b

    w1, b1 = lin(ks[0], in_dim, HIDDEN)
    w2, b2 = lin(ks[1], HIDDEN, HIDDEN)
    w3, b3 = lin(ks[2], HIDDEN, HIDDEN)
    w4, b4 = lin(ks[3], HIDDEN, OUT_DIM)

    def bn(kg, kb, km, kv, dim):
        gamma = 1.0 + 0.1 * jax.random.normal(kg, (1, dim), jnp.float32)
        beta = 0.1 * jax.random.normal(kb, (1, dim), jnp.float32)
        rmean = 0.1 * jax.random.normal(km, (1, dim), jnp.float32)
        rvar = 1.0 + 0.1 * jax.random.uniform(kv, (1, dim), jnp.float32)
        return gamma, beta, rmean, rvar

    g2, be2, rm2, rv2 = bn(ks[4], ks[5], ks[6], ks[7], HIDDEN)
    g3, be3, rm3, rv3 = bn(ks[8], ks[9], ks[10], ks[11], HIDDEN)

    return (w1, b1, w2, b2, g2, be2, rm2, rv2,
            w3, b3, g3, be3, rm3, rv3, w4, b4)


def reference_forward_f32(noise, attri, raw_params):
    """Faithful full-precision reference (un-folded BN, eval mode)."""
    (w1, b1, w2, b2, g2, be2, rm2, rv2,
     w3, b3, g3, be3, rm3, rv3, w4, b4) = raw_params
    x = jnp.concatenate([attri, noise], axis=-1)
    h = x @ w1 + b1
    h = jnp.where(h > 0, h, LEAKY_SLOPE * h)
    h = h @ w2 + b2
    h = (h - rm2) / jnp.sqrt(rv2 + BN_EPS) * g2 + be2
    h = h @ w3 + b3
    h = (h - rm3) / jnp.sqrt(rv3 + BN_EPS) * g3 + be3
    h = jnp.where(h > 0, h, LEAKY_SLOPE * h)
    return h @ w4 + b4


def reference_forward_matched(noise, attri, packed):
    """Pure-JAX reference using exactly the kernel's folded bf16 parameters/casts."""
    w1a, w1b, w2f, w3f, w4, b1, b2f, b3f, b4 = packed
    h = (jnp.dot(attri.astype(jnp.bfloat16), w1a, preferred_element_type=jnp.float32)
         + jnp.dot(noise.astype(jnp.bfloat16), w1b, preferred_element_type=jnp.float32)
         + b1)
    h = jnp.where(h > 0, h, LEAKY_SLOPE * h)
    h2 = (jnp.dot(h.astype(jnp.bfloat16), w2f, preferred_element_type=jnp.float32)
          + b2f).astype(jnp.bfloat16)
    h3 = jnp.dot(h2, w3f, preferred_element_type=jnp.float32) + b3f
    h3 = jnp.where(h3 > 0, h3, LEAKY_SLOPE * h3)
    return jnp.dot(h3.astype(jnp.bfloat16), w4, preferred_element_type=jnp.float32) + b4


if __name__ == "__main__":
    key = jax.random.PRNGKey(0)
    k_noise, k_attri, k_params = jax.random.split(key, 3)

    noise = jax.random.normal(k_noise, (BATCH, NOISE_DIM), jnp.float32)
    attri = jax.random.normal(k_attri, (BATCH, ATTRI_DIM), jnp.float32)

    raw_params = init_params(k_params)
    packed = prepare_params(raw_params)   # one-time host prep (BN fold, bf16 cast)

    img = generator_forward(noise, attri, packed)
    img = jax.block_until_ready(img)
    assert img.shape == (BATCH, OUT_DIM)

    # Exact-math check (same folded bf16 params; XLA vs Pallas/MXU + chunked reduction).
    ref_matched = reference_forward_matched(noise, attri, packed)
    assert jnp.allclose(img, ref_matched, atol=1e-2, rtol=1e-2)

    # Semantic check against the faithful f32 un-folded module (bf16 quantization
    # of weights/activations is the only difference).
    ref_f32 = reference_forward_f32(noise, attri, raw_params)
    assert jnp.allclose(img, ref_f32, atol=5e-2, rtol=5e-2)

    print("KERNEL_OK")
</pallas_src>

<mosaic_0001>
module attributes {stable_mosaic.version = 11 : i64} {
  func.func @generator_kernel(%arg0: i32, %arg1: i32, %arg2: memref<16x256xf32, #tpu.memory_space<vmem>>, %arg3: memref<16x128xf32, #tpu.memory_space<vmem>>, %arg4: memref<256x512xbf16, #tpu.memory_space<vmem>>, %arg5: memref<128x512xbf16, #tpu.memory_space<vmem>>, %arg6: memref<512x128xbf16, #tpu.memory_space<vmem>>, %arg7: memref<128x512xbf16, #tpu.memory_space<vmem>>, %arg8: memref<512x128xbf16, #tpu.memory_space<vmem>>, %arg9: memref<1x512xf32, #tpu.memory_space<vmem>>, %arg10: memref<1x128xf32, #tpu.memory_space<vmem>>, %arg11: memref<1x512xf32, #tpu.memory_space<vmem>>, %arg12: memref<1x128xf32, #tpu.memory_space<vmem>>, %arg13: memref<16x128xf32, #tpu.memory_space<vmem>>, %arg14: memref<16x512xbf16, #tpu.memory_space<vmem>>, %arg15: memref<4x16x128xbf16, #tpu.memory_space<vmem>>, %arg16: memref<16x512xf32, #tpu.memory_space<vmem>>, %arg17: memref<16x512xbf16, #tpu.memory_space<vmem>>) attributes {dimension_semantics = [#tpu.dimension_semantics<parallel>, #tpu.dimension_semantics<arbitrary>], iteration_bounds = array<i64: 2, 11>, scalar_prefetch = 0 : i64, scratch_operands = 4 : i64, tpu.core_type = #tpu.core_type<tc>, window_params = [{transform_indices = @transform_0, window_bounds = array<i64: 16, 256>}, {transform_indices = @transform_1, window_bounds = array<i64: 16, 128>}, {pipeline_mode = #tpu.pipeline_mode<synchronous>, transform_indices = @transform_2, window_bounds = array<i64: 256, 512>}, {pipeline_mode = #tpu.pipeline_mode<synchronous>, transform_indices = @transform_3, window_bounds = array<i64: 128, 512>}, {transform_indices = @transform_4, window_bounds = array<i64: 512, 128>}, {transform_indices = @transform_5, window_bounds = array<i64: 128, 512>}, {transform_indices = @transform_6, window_bounds = array<i64: 512, 128>}, {pipeline_mode = #tpu.pipeline_mode<synchronous>, transform_indices = @transform_7, window_bounds = array<i64: 1, 512>}, {transform_indices = @transform_8, window_bounds = array<i64: 1, 128>}, {pipeline_mode = #tpu.pipeline_mode<synchronous>, transform_indices = @transform_9, window_bounds = array<i64: 1, 512>}, {transform_indices = @transform_10, window_bounds = array<i64: 1, 128>}, {transform_indices = @transform_11, window_bounds = array<i64: 16, 128>}]} {
    %c0_i32 = arith.constant 0 : i32
    %0 = arith.cmpi eq, %arg1, %c0_i32 : i32
    %1 = arith.extui %0 : i1 to i32
    %c0_i32_0 = arith.constant 0 : i32
    %2 = arith.cmpi ne, %1, %c0_i32_0 : i32
    scf.if %2 {
      %c0 = arith.constant 0 : index
      %c0_7 = arith.constant 0 : index
      %17 = vector.load %arg2[%c0, %c0_7] : memref<16x256xf32, #tpu.memory_space<vmem>>, vector<16x256xf32>
      %18 = arith.truncf %17 : vector<16x256xf32> to vector<16x256xbf16>
      %c0_8 = arith.constant 0 : index
      %c0_9 = arith.constant 0 : index
      %19 = vector.load %arg4[%c0_8, %c0_9] : memref<256x512xbf16, #tpu.memory_space<vmem>>, vector<256x512xbf16>
      %cst = arith.constant dense<0.000000e+00> : vector<16x512xf32>
      %20 = tpu.matmul %18, %19, %cst {dimension_numbers = #tpu.dot_dimension_numbers<[1], [0], [0], [1], [0, 0, 1, 1], [], []>} : vector<16x256xbf16>, vector<256x512xbf16>, vector<16x512xf32> -> vector<16x512xf32>
      %c0_10 = arith.constant 0 : index
      %c0_11 = arith.constant 0 : index
      %21 = vector.load %arg3[%c0_10, %c0_11] : memref<16x128xf32, #tpu.memory_space<vmem>>, vector<16x128xf32>
      %22 = arith.truncf %21 : vector<16x128xf32> to vector<16x128xbf16>
      %c0_12 = arith.constant 0 : index
      %c0_13 = arith.constant 0 : index
      %23 = vector.load %arg5[%c0_12, %c0_13] : memref<128x512xbf16, #tpu.memory_space<vmem>>, vector<128x512xbf16>
      %cst_14 = arith.constant dense<0.000000e+00> : vector<16x512xf32>
      %24 = tpu.matmul %22, %23, %cst_14 {dimension_numbers = #tpu.dot_dimension_numbers<[1], [0], [0], [1], [0, 0, 1, 1], [], []>} : vector<16x128xbf16>, vector<128x512xbf16>, vector<16x512xf32> -> vector<16x512xf32>
      %25 = arith.addf %20, %24 : vector<16x512xf32>
      %c0_15 = arith.constant 0 : index
      %c0_16 = arith.constant 0 : index
      %26 = vector.load %arg9[%c0_15, %c0_16] : memref<1x512xf32, #tpu.memory_space<vmem>>, vector<1x512xf32>
      %27 = vector.broadcast %26 : vector<1x512xf32> to vector<16x512xf32>
      %28 = arith.addf %25, %27 : vector<16x512xf32>
      %cst_17 = arith.constant 0.000000e+00 : f32
      %29 = vector.broadcast %cst_17 : f32 to vector<16x512xf32>
      %30 = arith.cmpf ogt, %28, %29 : vector<16x512xf32>
      %cst_18 = arith.constant 2.000000e-01 : f32
      %31 = vector.broadcast %cst_18 : f32 to vector<16x512xf32>
      %32 = arith.mulf %31, %28 : vector<16x512xf32>
      %33 = arith.select %30, %28, %32 : vector<16x512xi1>, vector<16x512xf32>
      %34 = arith.truncf %33 : vector<16x512xf32> to vector<16x512xbf16>
      %c0_19 = arith.constant 0 : index
      %c0_20 = arith.constant 0 : index
      %35 = vector.load %arg14[%c0_19, %c0_20] : memref<16x512xbf16, #tpu.memory_space<vmem>>, vector<16x512xbf16>
      tpu.vector_store %arg14[%c0_19, %c0_20], %34 {strides = array<i32>} : memref<16x512xbf16, #tpu.memory_space<vmem>>, vector<16x512xbf16>,
      %cst_21 = arith.constant 0.000000e+00 : f32
      %36 = vector.broadcast %cst_21 : f32 to vector<16x512xf32>
      %c0_22 = arith.constant 0 : index
      %c0_23 = arith.constant 0 : index
      %37 = vector.load %arg16[%c0_22, %c0_23] : memref<16x512xf32, #tpu.memory_space<vmem>>, vector<16x512xf32>
      tpu.vector_store %arg16[%c0_22, %c0_23], %36 {strides = array<i32>} : memref<16x512xf32, #tpu.memory_space<vmem>>, vector<16x512xf32>,
    } else {
    }
    %c4_i32 = arith.constant 4 : i32
    %3 = arith.cmpi slt, %arg1, %c4_i32 : i32
    %4 = arith.extui %3 : i1 to i32
    %c0_i32_1 = arith.constant 0 : i32
    %5 = arith.cmpi ne, %4, %c0_i32_1 : i32
    scf.if %5 {
      %c0 = arith.constant 0 : index
      %c0_7 = arith.constant 0 : index
      %17 = vector.load %arg14[%c0, %c0_7] : memref<16x512xbf16, #tpu.memory_space<vmem>>, vector<16x512xbf16>
      %c0_8 = arith.constant 0 : index
      %c0_9 = arith.constant 0 : index
      %18 = vector.load %arg6[%c0_8, %c0_9] : memref<512x128xbf16, #tpu.memory_space<vmem>>, vector<512x128xbf16>
      %cst = arith.constant dense<0.000000e+00> : vector<16x128xf32>
      %19 = tpu.matmul %17, %18, %cst {dimension_numbers = #tpu.dot_dimension_numbers<[1], [0], [0], [1], [0, 0, 1, 1], [], []>} : vector<16x512xbf16>, vector<512x128xbf16>, vector<16x128xf32> -> vector<16x128xf32>
      %c0_10 = arith.constant 0 : index
      %c0_11 = arith.constant 0 : index
      %20 = vector.load %arg10[%c0_10, %c0_11] : memref<1x128xf32, #tpu.memory_space<vmem>>, vector<1x128xf32>
      %21 = vector.broadcast %20 : vector<1x128xf32> to vector<16x128xf32>
      %22 = arith.addf %19, %21 : vector<16x128xf32>
      %23 = arith.truncf %22 : vector<16x128xf32> to vector<16x128xbf16>
      %24 = arith.index_cast %arg1 : i32 to index
      %c0_12 = arith.constant 0 : index
      %c0_13 = arith.constant 0 : index
      %25 = vector.load %arg15[%24, %c0_12, %c0_13] : memref<4x16x128xbf16, #tpu.memory_space<vmem>>, vector<1x16x128xbf16>
      %26 = vector.shape_cast %25 : vector<1x16x128xbf16> to vector<16x128xbf16>
      %27 = vector.shape_cast %23 : vector<16x128xbf16> to vector<1x16x128xbf16>
      tpu.vector_store %arg15[%24, %c0_12, %c0_13], %27 {strides = array<i32>} : memref<4x16x128xbf16, #tpu.memory_space<vmem>>, vector<1x16x128xbf16>,
    } else {
    }
    %c4_i32_2 = arith.constant 4 : i32
    %6 = arith.cmpi sge, %arg1, %c4_i32_2 : i32
    %c8_i32 = arith.constant 8 : i32
    %7 = arith.cmpi slt, %arg1, %c8_i32 : i32
    %8 = arith.andi %6, %7 : i1
    %9 = arith.extui %8 : i1 to i32
    %c0_i32_3 = arith.constant 0 : i32
    %10 = arith.cmpi ne, %9, %c0_i32_3 : i32
    scf.if %10 {
      %c4_i32_7 = arith.constant 4 : i32
      %17 = arith.subi %arg1, %c4_i32_7 : i32
      %c0 = arith.constant 0 : index
      %c0_8 = arith.constant 0 : index
      %18 = vector.load %arg16[%c0, %c0_8] : memref<16x512xf32, #tpu.memory_space<vmem>>, vector<16x512xf32>
      %19 = arith.index_cast %17 : i32 to index
      %c0_9 = arith.constant 0 : index
      %c0_10 = arith.constant 0 : index
      %20 = vector.load %arg15[%19, %c0_9, %c0_10] : memref<4x16x128xbf16, #tpu.memory_space<vmem>>, vector<1x16x128xbf16>
      %21 = vector.shape_cast %20 : vector<1x16x128xbf16> to vector<16x128xbf16>
      %c0_11 = arith.constant 0 : index
      %c0_12 = arith.constant 0 : index
      %22 = vector.load %arg7[%c0_11, %c0_12] : memref<128x512xbf16, #tpu.memory_space<vmem>>, vector<128x512xbf16>
      %cst = arith.constant dense<0.000000e+00> : vector<16x512xf32>
      %23 = tpu.matmul %21, %22, %cst {dimension_numbers = #tpu.dot_dimension_numbers<[1], [0], [0], [1], [0, 0, 1, 1], [], []>} : vector<16x128xbf16>, vector<128x512xbf16>, vector<16x512xf32> -> vector<16x512xf32>
      %24 = arith.addf %18, %23 : vector<16x512xf32>
      %c0_13 = arith.constant 0 : index
      %c0_14 = arith.constant 0 : index
      %25 = vector.load %arg16[%c0_13, %c0_14] : memref<16x512xf32, #tpu.memory_space<vmem>>, vector<16x512xf32>
      tpu.vector_store %arg16[%c0_13, %c0_14], %24 {strides = array<i32>} : memref<16x512xf32, #tpu.memory_space<vmem>>, vector<16x512xf32>,
    } else {
    }
    %c7_i32 = arith.constant 7 : i32
    %11 = arith.cmpi eq, %arg1, %c7_i32 : i32
    %12 = arith.extui %11 : i1 to i32
    %c0_i32_4 = arith.constant 0 : i32
    %13 = arith.cmpi ne, %12, %c0_i32_4 : i32
    scf.if %13 {
      %c0 = arith.constant 0 : index
      %c0_7 = arith.constant 0 : index
      %17 = vector.load %arg16[%c0, %c0_7] : memref<16x512xf32, #tpu.memory_space<vmem>>, vector<16x512xf32>
      %c0_8 = arith.constant 0 : index
      %c0_9 = arith.constant 0 : index
      %18 = vector.load %arg11[%c0_8, %c0_9] : memref<1x512xf32, #tpu.memory_space<vmem>>, vector<1x512xf32>
      %19 = vector.broadcast %18 : vector<1x512xf32> to vector<16x512xf32>
      %20 = arith.addf %17, %19 : vector<16x512xf32>
      %cst = arith.constant 0.000000e+00 : f32
      %21 = vector.broadcast %cst : f32 to vector<16x512xf32>
      %22 = arith.cmpf ogt, %20, %21 : vector<16x512xf32>
      %cst_10 = arith.constant 2.000000e-01 : f32
      %23 = vector.broadcast %cst_10 : f32 to vector<16x512xf32>
      %24 = arith.mulf %23, %20 : vector<16x512xf32>
      %25 = arith.select %22, %20, %24 : vector<16x512xi1>, vector<16x512xf32>
      %26 = arith.truncf %25 : vector<16x512xf32> to vector<16x512xbf16>
      %c0_11 = arith.constant 0 : index
      %c0_12 = arith.constant 0 : index
      %27 = vector.load %arg17[%c0_11, %c0_12] : memref<16x512xbf16, #tpu.memory_space<vmem>>, vector<16x512xbf16>
      tpu.vector_store %arg17[%c0_11, %c0_12], %26 {strides = array<i32>} : memref<16x512xbf16, #tpu.memory_space<vmem>>, vector<16x512xbf16>,
    } else {
    }
    %c8_i32_5 = arith.constant 8 : i32
    %14 = arith.cmpi sge, %arg1, %c8_i32_5 : i32
    %15 = arith.extui %14 : i1 to i32
    %c0_i32_6 = arith.constant 0 : i32
    %16 = arith.cmpi ne, %15, %c0_i32_6 : i32
    scf.if %16 {
      %c0 = arith.constant 0 : index
      %c0_7 = arith.constant 0 : index
      %17 = vector.load %arg17[%c0, %c0_7] : memref<16x512xbf16, #tpu.memory_space<vmem>>, vector<16x512xbf16>
      %c0_8 = arith.constant 0 : index
      %c0_9 = arith.constant 0 : index
      %18 = vector.load %arg8[%c0_8, %c0_9] : memref<512x128xbf16, #tpu.memory_space<vmem>>, vector<512x128xbf16>
      %cst = arith.constant dense<0.000000e+00> : vector<16x128xf32>
      %19 = tpu.matmul %17, %18, %cst {dimension_numbers = #tpu.dot_dimension_numbers<[1], [0], [0], [1], [0, 0, 1, 1], [], []>} : vector<16x512xbf16>, vector<512x128xbf16>, vector<16x128xf32> -> vector<16x128xf32>
      %c0_10 = arith.constant 0 : index
      %c0_11 = arith.constant 0 : index
      %20 = vector.load %arg12[%c0_10, %c0_11] : memref<1x128xf32, #tpu.memory_space<vmem>>, vector<1x128xf32>
      %21 = vector.broadcast %20 : vector<1x128xf32> to vector<16x128xf32>
      %22 = arith.addf %19, %21 : vector<16x128xf32>
      %c0_12 = arith.constant 0 : index
      %c0_13 = arith.constant 0 : index
      %23 = vector.load %arg13[%c0_12, %c0_13] : memref<16x128xf32, #tpu.memory_space<vmem>>, vector<16x128xf32>
      tpu.vector_store %arg13[%c0_12, %c0_13], %22 {strides = array<i32>} : memref<16x128xf32, #tpu.memory_space<vmem>>, vector<16x128xf32>,
    } else {
    }
    return
  }
  func.func @transform_0(%arg0: i32, %arg1: i32) -> (i32, i32) {
    %c0_i32 = arith.constant 0 : i32
    %c0_i32_0 = arith.constant 0 : i32
    return %arg0, %c0_i32 : i32, i32
  }
  func.func @transform_1(%arg0: i32, %arg1: i32) -> (i32, i32) {
    %c0_i32 = arith.constant 0 : i32
    %c0_i32_0 = arith.constant 0 : i32
    return %arg0, %c0_i32 : i32, i32
  }
  func.func @transform_2(%arg0: i32, %arg1: i32) -> (i32, i32) {
    %c0_i32 = arith.constant 0 : i32
    %c0_i32_0 = arith.constant 0 : i32
    %c0_i32_1 = arith.constant 0 : i32
    return %c0_i32, %c0_i32_0 : i32, i32
  }
  func.func @transform_3(%arg0: i32, %arg1: i32) -> (i32, i32) {
    %c0_i32 = arith.constant 0 : i32
    %c0_i32_0 = arith.constant 0 : i32
    %c0_i32_1 = arith.constant 0 : i32
    return %c0_i32, %c0_i32_0 : i32, i32
  }
  func.func @transform_4(%arg0: i32, %arg1: i32) -> (i32, i32) {
    %c0_i32 = arith.constant 0 : i32
    %0 = arith.maxsi %arg1, %c0_i32 : i32
    %c3_i32 = arith.constant 3 : i32
    %1 = arith.minsi %0, %c3_i32 : i32
    %c0_i32_0 = arith.constant 0 : i32
    %c0_i32_1 = arith.constant 0 : i32
    return %c0_i32_0, %1 : i32, i32
  }
  func.func @transform_5(%arg0: i32, %arg1: i32) -> (i32, i32) {
    %c4_i32 = arith.constant 4 : i32
    %0 = arith.subi %arg1, %c4_i32 : i32
    %c0_i32 = arith.constant 0 : i32
    %1 = arith.maxsi %0, %c0_i32 : i32
    %c3_i32 = arith.constant 3 : i32
    %2 = arith.minsi %1, %c3_i32 : i32
    %c0_i32_0 = arith.constant 0 : i32
    %c0_i32_1 = arith.constant 0 : i32
    return %2, %c0_i32_0 : i32, i32
  }
  func.func @transform_6(%arg0: i32, %arg1: i32) -> (i32, i32) {
    %c4_i32 = arith.constant 4 : i32
    %0 = arith.subi %arg1, %c4_i32 : i32
    %c4_i32_0 = arith.constant 4 : i32
    %1 = arith.subi %0, %c4_i32_0 : i32
    %c0_i32 = arith.constant 0 : i32
    %2 = arith.maxsi %1, %c0_i32 : i32
    %c2_i32 = arith.constant 2 : i32
    %3 = arith.minsi %2, %c2_i32 : i32
    %c0_i32_1 = arith.constant 0 : i32
    %c0_i32_2 = arith.constant 0 : i32
    return %c0_i32_1, %3 : i32, i32
  }
  func.func @transform_7(%arg0: i32, %arg1: i32) -> (i32, i32) {
    %c0_i32 = arith.constant 0 : i32
    %c0_i32_0 = arith.constant 0 : i32
    %c0_i32_1 = arith.constant 0 : i32
    return %c0_i32, %c0_i32_0 : i32, i32
  }
  func.func @transform_8(%arg0: i32, %arg1: i32) -> (i32, i32) {
    %c0_i32 = arith.constant 0 : i32
    %0 = arith.maxsi %arg1, %c0_i32 : i32
    %c3_i32 = arith.constant 3 : i32
    %1 = arith.minsi %0, %c3_i32 : i32
    %c0_i32_0 = arith.constant 0 : i32
    %c0_i32_1 = arith.constant 0 : i32
    return %c0_i32_0, %1 : i32, i32
  }
  func.func @transform_9(%arg0: i32, %arg1: i32) -> (i32, i32) {
    %c0_i32 = arith.constant 0 : i32
    %c0_i32_0 = arith.constant 0 : i32
    %c0_i32_1 = arith.constant 0 : i32
    return %c0_i32, %c0_i32_0 : i32, i32
  }
  func.func @transform_10(%arg0: i32, %arg1: i32) -> (i32, i32) {
    %c4_i32 = arith.constant 4 : i32
    %0 = arith.subi %arg1, %c4_i32 : i32
    %c4_i32_0 = arith.constant 4 : i32
    %1 = arith.subi %0, %c4_i32_0 : i32
    %c0_i32 = arith.constant 0 : i32
    %2 = arith.maxsi %1, %c0_i32 : i32
    %c2_i32 = arith.constant 2 : i32
    %3 = arith.minsi %2, %c2_i32 : i32
    %c0_i32_1 = arith.constant 0 : i32
    %c0_i32_2 = arith.constant 0 : i32
    return %c0_i32_1, %3 : i32, i32
  }
  func.func @transform_11(%arg0: i32, %arg1: i32) -> (i32, i32) {
    %c4_i32 = arith.constant 4 : i32
    %0 = arith.subi %arg1, %c4_i32 : i32
    %c4_i32_0 = arith.constant 4 : i32
    %1 = arith.subi %0, %c4_i32_0 : i32
    %c0_i32 = arith.constant 0 : i32
    %2 = arith.maxsi %1, %c0_i32 : i32
    %c2_i32 = arith.constant 2 : i32
    %3 = arith.minsi %2, %c2_i32 : i32
    %c0_i32_1 = arith.constant 0 : i32
    return %arg0, %3 : i32, i32
  }
}

</mosaic_0001>

<bundles_post_ra>
// kernel: generator_forward.1
= control target key start
LH: loop header
LB: loop body
LE: loop exit
PB: predicated region body
PF: predicated region fallthrough
CT: control target
= control target key end

     0   :  { %s5624_s0 = inlined_call_operand.hbm [shape: f32[32,256], index: 0, kind: input, shape index: {}]   ;;  %s5625_s1 = inlined_call_operand.hbm [shape: f32[32,128], index: 1, kind: input, shape index: {}]   ;;  %s5626_s2 = inlined_call_operand.hbm [shape: bf16[256,512], index: 2, kind: input, shape index: {}]   ;;  %s5627_s3 = inlined_call_operand.hbm [shape: bf16[128,512], index: 3, kind: input, shape index: {}]   ;;  %s5628_s4 = inlined_call_operand.hbm [shape: bf16[512,512], index: 4, kind: input, shape index: {}]   ;;  %s5629_s5 = inlined_call_operand.hbm [shape: bf16[512,512], index: 5, kind: input, shape index: {}]   ;;  %s5630_s6 = inlined_call_operand.hbm [shape: bf16[512,384], index: 6, kind: input, shape index: {}]   ;;  %s5631_s7 = inlined_call_operand.vmem [shape: f32[1,512], index: 7, kind: input, shape index: {}]   ;;  %s5632_s8 = inlined_call_operand.hbm [shape: f32[1,512], index: 8, kind: input, shape index: {}]   ;;  %s5633_s9 = inlined_call_operand.vmem [shape: f32[1,512], index: 9, kind: input, shape index: {}]   ;;  %s5634_s10 = inlined_call_operand.hbm [shape: f32[1,384], index: 10, kind: input, shape index: {}]   ;;  %s5635_s11 = inlined_call_operand.hbm [shape: f32[32,384], index: 11, kind: output, shape index: {}]  }
   0x1   :  { %5685 = sst [smem:[#allocation60_spill]] %s5624_s0 }
   0x2   :  { %5686 = sst [smem:[#allocation61_spill]] %s5625_s1 }
   0x3   :  { %5687 = sst [smem:[#allocation62_spill]] %s5626_s2 }
   0x4   :  { %5688 = sst [smem:[#allocation63_spill]] %s5627_s3 }
   0x5   :  { %5689 = sst [smem:[#allocation64_spill]] %s5628_s4 }
   0x6   :  { %5690 = sst [smem:[#allocation65_spill]] %s5629_s5 }
   0x7   :  { %5691 = sst [smem:[#allocation66_spill]] %s5630_s6 }
   0x8   :  { %5692 = sst [smem:[#allocation67_spill]] %s5631_s7 }
   0x9   :  { %5693 = sst [smem:[#allocation68_spill]] %s5632_s8 }
   0xa   :  { %5694 = sst [smem:[#allocation69_spill]] %s5633_s9 }
   0xb   :  { %5695 = sst [smem:[#allocation70_spill]] %s5634_s10 }
   0xc   :  { %5696 = sst [smem:[#allocation71_spill]] %s5635_s11 }
   0xd   :  { %16 = vsyncpa [#allocation7], 0 }
   0xe   :  { %18 = vsyncpa [#allocation7 + $0x1], 0 }
   0xf   :  { %19 = vsyncpa [#allocation10], 0 }
  0x10   :  { %21 = vsyncpa [#allocation10 + $0x1], 0 }
  0x11   :  { %22 = vsyncpa [#allocation13], 0 }
  0x12   :  { %23 = vsyncpa [#allocation8], 0 }
  0x13   :  { %25 = vsyncpa [#allocation8 + $0x1], 0  ;;  %s4909_s17 = smov 0   ;;  %s4911_s18 = smov 0  }
  0x14   :  { %s4913_s19 = smov 0   ;;  %s4915_s20 = smov 0  }
  0x15   :  { %s4917_s21 = smov 0   ;;  %s4919_s22 = smov 0  }
  0x16   :  { %s4921_s23 = smov 0   ;;  %s4923_s24 = smov 0  }
  0x17   :  { %s4925_s25 = smov 0   ;;  %s4927_s26 = smov 0  }
  0x18   :  { %s4929_s27 = smov 0   ;;  %s4931_s28 = smov 0  }
  0x19   :  { %s4933_s29 = smov 0   ;;  %s4935_s30 = smov 0  }
  0x1a   :  { %s4937_s12 = smov 0   ;;  %s4939_s13 = smov 0  }
  0x1b   :  { %s4941_s14 = smov 0   ;;  %s4943_s15 = smov 0  }
  0x1c   :  { %s4945_s16 = smov 0   ;;  %s4947_s11 = smov 0  }
  0x1d LB: > { %5697 = sst [smem:[#allocation30_spill]] %s4758_s17  ;;  %s5010_s9 = sadd.s32 4294967295, %s4834_s11   ;;  %s4834_s11 = sphi %s4947_s11, %s31_s11   ;;  %s4830_s16 = sphi %s4945_s16, %s5821_s16   ;;  %s4826_s15 = sphi %s4943_s15, %s5820_s15   ;;  %s4822_s14 = sphi %s4941_s14, %s5819_s14   ;;  %s4818_s13 = sphi %s4939_s13, %s5818_s13   ;;  %s4814_s12 = sphi %s4937_s12, %s5817_s12   ;;  %s4810_s30 = sphi %s4935_s30, %s5816_s30   ;;  %s4806_s29 = sphi %s4933_s29, %s5815_s29   ;;  %s4802_s28 = sphi %s4931_s28, %s5824_s28   ;;  %s4798_s27 = sphi %s4929_s27, %s5823_s27   ;;  %s4794_s26 = sphi %s4927_s26, %s5822_s26   ;;  %s4790_s25 = sphi %s4925_s25, %s5813_s25   ;;  %s4786_s24 = sphi %s4923_s24, %s5812_s24   ;;  %s4782_s23 = sphi %s4921_s23, %s5811_s23   ;;  %s4778_s22 = sphi %s4919_s22, %s5810_s22   ;;  %s4774_s21 = sphi %s4917_s21, %s5809_s21   ;;  %s4770_s20 = sphi %s4915_s20, %s5808_s20   ;;  %s4766_s19 = sphi %s4913_s19, %s5807_s19   ;;  %s4762_s18 = sphi %s4911_s18, %s5806_s18   ;;  %s4758_s17 = sphi %s4909_s17, %s5805_s17  }
  0x1e   : > { %5698 = sst [smem:[#allocation31_spill]] %s4762_s18  ;;  %s2900_s7 = sadd.s32 4294967294, %s4834_s11  }
  0x1f   : > { %5699 = sst [smem:[#allocation32_spill]] %s4766_s19  ;;  %p5662_p0 = scmp.eq.s32.totalorder %s5010_s9, 0 }
  0x20   : > { %5700 = sst [smem:[#allocation33_spill]] %s4770_s20  ;;  %p384_p1 = scmp.ne.s32.totalorder %s4766_s19, %s4762_s18 }
  0x21   : > { %5701 = sst [smem:[#allocation34_spill]] %s4774_s21  ;;  %p385_p2 = scmp.eq.s32.totalorder %s5010_s9, 21 }
  0x22   : > { %5702 = sst [smem:[#allocation35_spill]] %s4778_s22  ;;  %p390_p3 = scmp.ne.s32.totalorder %s4762_s18, %s4758_s17 }
  0x23   : > { %5703 = sst [smem:[#allocation36_spill]] %s4786_s24  ;;  %p391_p4 = scmp.eq.s32.totalorder %s2900_s7, 21 }
  0x24   : > { %5704 = sst [smem:[#allocation37_spill]] %s4790_s25  ;;  %p2969_p5 = scmp.ge.s32.totalorder %s4834_s11, 1 }
  0x25   : > { %5705 = sst [smem:[#allocation38_spill]] %s4810_s30  ;;  %p5020_p6 = por %p385_p2, %p384_p1 }
  0x26   : > { %5706 = sst [smem:[#allocation39_spill]] %s4814_s12  ;;  %p398_p7 = scmp.lt.s32.totalorder %s4834_s11, 23 }
  0x27   : > { %5707 = sst [smem:[#allocation40_spill]] %s4818_s13  ;;  %p5025_p8 = por %p391_p4, %p390_p3 }
  0x28   : > { %5708 = sst [smem:[#allocation41_spill]] %s4822_s14  ;;  %p5029_p9 = pnand %p2969_p5, %p398_p7 }
  0x29   : > { %5709 = sst [smem:[#allocation42_spill]] %s4826_s15  ;;  %s5647_s17 = smov 256  }
  0x2a   : > { %5710 = sst [smem:[#allocation43_spill]] %s4830_s16  ;;  %p4124_p10 = pneg %p5029_p9 }
  0x2b   : > { %5711 = sst [smem:[#allocation44_spill]] %s4834_s11  ;;  %s5649_s7 = smov 16  }
  0x2c   : > { %5712 = sst [smem:[#allocation45_spill]] %s5010_s9  ;;  %p5040_p11 = pnand %p4124_p10, %p5662_p0 }
  0x2d   : > { %s5713_s14 = scalar_select %p5020_p6, 1, 0 }
  0x2e   : > { %s5715_s13 = scalar_select %p5025_p8, 1, 0 }
  0x2f   : > { %5714 = sst [smem:[#allocation46_spill]] %s5713_s14  ;;  %s4836_s14 = smov [#allocation11]  }
  0x30   : > { %5716 = sst [smem:[#allocation47_spill]] %s5715_s13  ;;  %s411_s13 = sshll.u32 %s4836_s14, 4  ;;  %s412_s13 = int_to_ptr.vmem [resolvable:$true] %s411_s13 }
  0x31   : > { %s5717_s10 = scalar_select %p5029_p9, 1, 0 }
  0x32   : > { %s5719_s2 = sld [smem:[#allocation62_spill]]  ;;  %s43_s14 = sadd.s32 1, %s4830_s16 }
  0x33   : > { %5718 = sst [smem:[#allocation48_spill]] %s5717_s10  ;;  %s50_s10 = sadd.s32 1, %s4814_s12 }
  0x34   : > { %s5720_s8 = scalar_select %p5040_p11, 1, 0 }
  0x35   : > { %p57_p13 = scmp.ne.s32.totalorder %s4814_s12, %s4810_s30  ;;  %p5675_p1 = scmp.eq.s32.totalorder %s4834_s11, 0 }
  0x36   : > { %5721 = sst [smem:[#allocation49_spill]] %s5720_s8  ;;  %p63_p3 = scmp.ne.s32.totalorder %s4810_s30, %s4806_s29 }
  0x37   : > { %p5060_p2 = por %p5675_p1, %p57_p13  ;;  %p5661_p5 = scmp.lt.s32.totalorder %s4834_s11, 22 }
  0x38   : > { %s409_s18 = sshll.u32 %s5719_s2, 4  ;;  %s40_s2 = sadd.s32 1, %s4826_s15  ;;  %s410_s18 = int_to_ptr.hbm [resolvable:$true] %s409_s18 }
  0x39   : > { %4127 = dma.hbm_to_vmem [thread:$0]  (!%p5040_p11), %s410_s18, 8192, %s412_s13, [#allocation10], %s5647_s17, %s5647_s17, %s5649_s7  }
  0x3a   : > { %p41_p12 = scmp.ge.s32.totalorder %s40_s2, 11  ;;  %p5069_p7 = por %p5662_p0, %p63_p3 }
  0x3b   : > { %s445_s13 = sand.u32 1, %s4834_s11   ;;  %s447_s17 = sand.u32 1, %s4814_s12  }
  0x3c   : > { %s5826_s2 = smov (%p41_p12, %s40_s2), 0  ;;  %s5828_s14 = smov (!%p41_p12, %s43_s14), %s4830_s16 }
  0x3d   : > { %5722 = sst [smem:[#allocation50_spill]] %s5826_s2  ;;  %p45_p4 = scmp.ge.s32.totalorder %s5828_s14, 2 }
  0x3e   : > { %s5724_s18 = scalar_select %p5069_p7, 1, 0 }
  0x3f   : > { %s5830_s14 = smov (%p45_p4, %s5828_s14), 0  ;;  %s2973_s8 = sshll.u32 %s447_s17, 5 }
  0x40   : > { %5725 = sst [smem:[#allocation51_spill]] %s5724_s18  ;;  %s5079_s7 = ssub.s32 %s4830_s16, %s5830_s14 }
  0x41   : > { %5726 = sst [smem:[#allocation52_spill]] %s5830_s14  ;;  %p48_p10 = scmp.eq.s32.totalorder %s5079_s7, 0 }
  0x42   : > { %s3875_s29 = sshll.u32 %s4830_s16, 5  ;;  %s449_s30 = scalar_lea.vmem [#allocation6], %s2973_s8 }
  0x43   : > { %s458_s6 = sshll.u32 %s449_s30, 4  ;;  %s5728_s0 = sld [smem:[#allocation60_spill]]  ;;  %s459_s6 = int_to_ptr.vmem [resolvable:$true] %s458_s6 }
  0x44   : > { %s5084_s19 = scalar_select %p48_p10, %s4814_s12, %s50_s10  }
  0x45   : > { %p5093_p12 = pnand %p5661_p5, %p5060_p2  ;;  %s2977_s8 = sshll.u32 %s447_s17, 4 }
  0x46   : > { %5727 = sst [smem:[#allocation53_spill]] %s5084_s19  ;;  %s5097_s10 = scalar_lea.sflag [#allocation7], %s445_s13 }
  0x47   : > { %s5730_s20 = smov 16   ;;  %s5731_s21 = smov 256  }
  0x48   : > { %s3876_s3 = sshll.u32 %s4830_s16, 4  ;;  %s472_s30 = scalar_lea.vmem [#allocation9], %s2977_s8 }
  0x49   : > { %s455_s18 = scalar_lea.hbm %s5728_s0, %s3875_s29  ;;  %s5732_s1 = sld [smem:[#allocation61_spill]] }
  0x4a   : > { %s456_s22 = sshll.u32 %s455_s18, 4  ;;  %s480_s18 = sshll.u32 %s472_s30, 4  ;;  %s457_s22 = int_to_ptr.hbm [resolvable:$true] %s456_s22  ;;  %s481_s18 = int_to_ptr.vmem [resolvable:$true] %s480_s18 }
  0x4b   : > { %4134 = dma.hbm_to_vmem [thread:$0]  (!%p5093_p12), %s457_s22, 512, %s459_s6, %s5097_s10, %s5731_s21, %s5731_s21, %s5730_s20  }
  0x4c   : > { %s5109_s19 = scalar_lea.sflag [#allocation10], %s445_s13  ;;  %s4839_s6 = smov 128  }
  0x4d   : > { %s4840_s22 = smov 8   ;;  %p141_p13 = scmp.gt.s32.totalorder %s4826_s15, 0 }
  0x4e   : > { %p2901_p2 = scmp.lt.s32.totalorder %s4826_s15, 3  ;;  %p145_p3 = scmp.gt.s32.totalorder %s5826_s2, 0 }
  0x4f   : > { %s477_s17 = scalar_lea.hbm %s5732_s1, %s3876_s3  ;;  %p2906_p4 = scmp.lt.s32.totalorder %s5826_s2, 3 }
  0x50   : > { %s478_s14 = sshll.u32 %s477_s17, 4  ;;  %s152_s13 = sadd.s32 1, %s4802_s28  ;;  %s479_s14 = int_to_ptr.hbm [resolvable:$true] %s478_s14 }
  0x51   : > { %4137 = dma.hbm_to_vmem [thread:$0]  (!%p5093_p12), %s479_s14, 256, %s481_s18, %s5109_s19, %s4839_s6, %s4839_s6, %s4840_s22  }
  0x52   : > { %s142_s0 = scalar_select %p141_p13, %s4826_s15, 0 }
  0x53   : > { %s146_s8 = scalar_select %p145_p3, %s5826_s2, 0 }
  0x54   : > { %s5832_s0 = smov (!%p2901_p2, %s142_s0), 3  ;;  %p159_p10 = scmp.ne.s32.totalorder %s4802_s28, %s4798_s27 }
  0x55   : > { %p165_p5 = scmp.ne.s32.totalorder %s4798_s27, %s4794_s26  ;;  %s5834_s8 = smov (!%p2906_p4, %s146_s8), 3 }
  0x56   : > { %p5129_p0 = por %p159_p10, %p5675_p1  ;;  %p5734_p12 = scmp.eq.s32.totalorder %s5010_s9, 0 }
  0x57   : > { %s149_s3 = ssub.s32 %s5832_s0, %s5834_s8  ;;  %s5667_s30 = sand.u32 1, %s4802_s28  }
  0x58   : > { %p5135_p8 = por %p165_p5, %p5734_p12  ;;  %p150_p13 = scmp.eq.s32.totalorder %s149_s3, 0 }
  0x59   : > { %s2980_s26 = sshll.u32 %s5667_s30, 8  ;;  %s2986_s18 = sshll.u32 %s5832_s0, 2 }
  0x5a   : > { %s5735_s14 = scalar_select %p5135_p8, 1, 0 }
  0x5b   : > { %s5145_s29 = scalar_select %p150_p13, %s4802_s28, %s152_s13  }
  0x5c   : > { %5736 = sst [smem:[#allocation54_spill]] %s5735_s14  ;;  %s494_s1 = scalar_lea.vmem [#allocation14], %s2980_s26 }
  0x5d   : > { %5737 = sst [smem:[#allocation55_spill]] %s5145_s29  ;;  %s505_s16 = sshll.u32 %s494_s1, 4  ;;  %s506_s16 = int_to_ptr.vmem [resolvable:$true] %s505_s16 }
  0x5e   : > { %s5738_s4 = sld [smem:[#allocation64_spill]]  ;;  %p5739_p5 = scmp.lt.s32.totalorder %s4834_s11, 22 }
  0x5f   : > { %s5668_s13 = smov 64   ;;  %s5669_s3 = smov 4  }
  0x60   : > { %p5154_p2 = pnand %p5739_p5, %p5129_p0  ;;  %s2911_s1 = sadd.s32 4294967292, %s4826_s15 }
  0x61   : > { %p176_p3 = scmp.gt.s32.totalorder %s2911_s1, 0  ;;  %p2912_p4 = scmp.lt.s32.totalorder %s2911_s1, 3 }
  0x62   : > { %s2917_s5 = sadd.s32 4294967292, %s5826_s2  ;;  %s188_s26 = sadd.s32 1, %s4790_s25 }
  0x63   : > { %s5836_s1 = smov (!%p176_p3, %s2911_s1), 0  ;;  %p181_p0 = scmp.gt.s32.totalorder %s2917_s5, 0 }
  0x64   : > { %s502_s22 = scalar_lea.hbm %s5738_s4, %s2986_s18  ;;  %p2918_p10 = scmp.lt.s32.totalorder %s2917_s5, 3 }
  0x65   : > { %s503_s12 = sshll.u32 %s502_s22, 4  ;;  %s5838_s1 = smov (!%p2912_p4, %s5836_s1), 3  ;;  %s504_s12 = int_to_ptr.hbm [resolvable:$true] %s503_s12 }
  0x66   : > { %4140 = dma.hbm_to_vmem [thread:$0]  (!%p5154_p2), %s504_s12, 4096, %s506_s16, %s5097_s10, %s5731_s21, %s5668_s13, %s5669_s3  }
  0x67   : > { %s5840_s5 = smov (!%p181_p0, %s2917_s5), 0  ;;  %p195_p12 = scmp.ne.s32.totalorder %s4790_s25, %s4786_s24 }
  0x68   : > { %p201_p13 = scmp.ne.s32.totalorder %s4786_s24, %s4782_s23  ;;  %s5842_s5 = smov (!%p2918_p10, %s5840_s5), 3 }
  0x69   : > { %p5173_p5 = por %p195_p12, %p5675_p1  ;;  %p5742_p6 = scmp.eq.s32.totalorder %s5010_s9, 0 }
  0x6a   : > { %s185_s16 = ssub.s32 %s5838_s1, %s5842_s5  ;;  %s517_s17 = sand.u32 1, %s4790_s25  }
  0x6b   : > { %p5179_p8 = por %p201_p13, %p5742_p6  ;;  %p186_p3 = scmp.eq.s32.totalorder %s185_s16, 0 }
  0x6c   : > { %s2987_s6 = sshll.u32 %s517_s17, 8  ;;  %s3882_s22 = sshll.u32 %s5838_s1, 8 }
  0x6d   : > { %s5743_s12 = scalar_select %p5179_p8, 1, 0 }
  0x6e   : > { %s5185_s30 = scalar_select %p186_p3, %s4790_s25, %s188_s26  }
  0x6f   : > { %5744 = sst [smem:[#allocation56_spill]] %s5743_s12  ;;  %s519_s29 = scalar_lea.vmem [#allocation15], %s2987_s6 }
  0x70   : > { %5745 = sst [smem:[#allocation57_spill]] %s5185_s30  ;;  %s533_s24 = sshll.u32 %s519_s29, 4  ;;  %s534_s24 = int_to_ptr.vmem [resolvable:$true] %s533_s24 }
  0x71   : > { %s5746_s3 = sld [smem:[#allocation65_spill]]  ;;  %p5747_p6 = scmp.lt.s32.totalorder %s4834_s11, 22 }
  0x73   : > { %p4141_p4 = pnand %p5747_p6, %p5173_p5 }
  0x75   : > { %p4462_p10 = pneg %p4141_p4 }
  0x77   : > { %s530_s4 = scalar_lea.hbm %s5746_s3, %s3882_s22  ;;  %s4465_s13 = scalar_lea.hbm %s5746_s3, 1024 }
  0x78   : > { %s531_s14 = sshll.u32 %s530_s4, 4  ;;  %s532_s14 = int_to_ptr.hbm [resolvable:$true] %s531_s14 }
  0x79   : > { %s4458_s12 = sshra.s32 %s532_s14, 4  ;;  %s4459_s12 = int_to_ptr.hbm [resolvable:$true] %s4458_s12 }
  0x7a   : > { %s4460_s5 = scalar_lea.hbm %s4459_s12, 256 }
  0x7b   : > { %p4461_p0 = scmp.ne.s32.totalorder %s4459_s12, %s4460_s5  ;;  %p4467_p3 = scmp.lt.s32.totalorder %s4465_s13, %s4460_s5 }
  0x7d   : > { %p4463_p12 = pnand %p4462_p10, %p4461_p0 }
  0x7f   : > { %p4464_p13 = pneg %p4463_p12 }
  0x81   : > { %p4469_p1 = pnand %p4467_p3, %p4464_p13 }
  0x83   : > { %4472 = shalt.err (!%p4469_p1)
}
  0x84   : > { %s5748_s4 = sld [smem:[#allocation35_spill]]  ;;  %s2923_s12 = sadd.s32 4294967288, %s4826_s15 }
  0x85   : > { %s5749_s29 = sld [smem:[#allocation34_spill]]  ;;  %p212_p5 = scmp.gt.s32.totalorder %s2923_s12, 0 }
  0x86   : > { %s5750_s18 = sld [smem:[#allocation33_spill]]  ;;  %p2924_p6 = scmp.lt.s32.totalorder %s2923_s12, 2 }
  0x87   : > { %4143 = dma.hbm_to_vmem [thread:$0]  (!%p4141_p4), %s532_s14, 4096, %s534_s24, %s5109_s19, %s5731_s21, %s5731_s21, %s5730_s20  }
  0x88   : > { %s5751_s16 = sld [smem:[#allocation32_spill]]  ;;  %s2929_s17 = sadd.s32 4294967288, %s5826_s2 }
  0x89   : > { %s5844_s12 = smov (!%p212_p5, %s2923_s12), 0  ;;  %p217_p1 = scmp.gt.s32.totalorder %s2929_s17, 0 }
  0x8a   : > { %s224_s6 = sadd.s32 1, %s5748_s4  ;;  %p2930_p0 = scmp.lt.s32.totalorder %s2929_s17, 2 }
  0x8b   : > { %s5846_s12 = smov (!%p2924_p6, %s5844_s12), 2  ;;  %s5848_s17 = smov (!%p217_p1, %s2929_s17), 0 }
  0x8c   : > { %p231_p4 = scmp.ne.s32.totalorder %s5748_s4, %s5749_s29  ;;  %p237_p10 = scmp.ne.s32.totalorder %s5749_s29, %s5750_s18 }
  0x8d   : > { %s5850_s17 = smov (!%p2930_p0, %s5848_s17), 2  ;;  %p5752_p12 = scmp.eq.s32.totalorder %s4834_s11, 0 }
  0x8e   : > { %p5754_p3 = scmp.eq.s32.totalorder %s5010_s9, 0  ;;  %s221_s22 = ssub.s32 %s5846_s12, %s5850_s17 }
  0x8f   : > { %p5212_p13 = por %p231_p4, %p5752_p12  ;;  %s374_s23 = sadd.s32 1, %s5751_s16 }
  0x90   : > { %p5218_p5 = por %p237_p10, %p5754_p3  ;;  %p222_p6 = scmp.eq.s32.totalorder %s221_s22, 0 }
  0x91   : > { %s371_s5 = sor.u32 %s221_s22, %s5079_s7  ;;  %s5680_s1 = sand.u32 1, %s5748_s4  }
  0x92   : > { %p372_p1 = scmp.eq.s32.totalorder %s371_s5, 0  ;;  %s2997_s13 = sshll.u32 %s5680_s1, 8 }
  0x93   : > { %s5227_s26 = scalar_select %p222_p6, %s5748_s4, %s224_s6  }
  0x94   : > { %s5852_s16 = smov (!%p372_p1, %s5751_s16), %s374_s23  ;;  %s3004_s29 = sshll.u32 %s5846_s12, 2 }
  0x95   : > { %5756 = sst [smem:[#allocation58_spill]] %s5227_s26  ;;  %s547_s25 = scalar_lea.vmem [#allocation16], %s2997_s13 }
  0x96   : > { %5757 = sst [smem:[#allocation59_spill]] %s5852_s16  ;;  %s559_s7 = sshll.u32 %s547_s25, 4  ;;  %s560_s7 = int_to_ptr.vmem [resolvable:$true] %s559_s7 }
  0x97   : > { %s5758_s2 = sld [smem:[#allocation66_spill]]  ;;  %p5760_p0 = scmp.lt.s32.totalorder %s4834_s11, 22 }
  0x98   : > { %s5762_s5 = sld [smem:[#allocation63_spill]]  ;;  %s4843_s3 = smov 192  }
  0x99   : > { %p5242_p4 = pnand %p5760_p0, %p5212_p13  ;;  %s4844_s25 = smov [#allocation12]  }
  0x9a   : > { %s425_s13 = sshll.u32 %s4844_s25, 4  ;;  %s5765_s18 = sld [smem:[#allocation68_spill]]  ;;  %s426_s13 = int_to_ptr.vmem [resolvable:$true] %s425_s13 }
  0x9b   : > { %s5767_s23 = sand.u32 1, %s4802_s28   ;;  %p4552_p12 = pneg %p5154_p2 }
  0x9d   : > { %s556_s15 = scalar_lea.hbm %s5758_s2, %s3004_s29  ;;  %s5763_s2 = smov 4  }
  0x9e   : > { %s557_s30 = sshll.u32 %s556_s15, 4  ;;  %s423_s1 = sshll.u32 %s5762_s5, 4  ;;  %s558_s30 = int_to_ptr.hbm [resolvable:$true] %s557_s30  ;;  %s424_s1 = int_to_ptr.hbm [resolvable:$true] %s423_s1 }
  0x9f   : > { %s5764_s15 = smov 64   ;;  %s572_s5 = scalar_lea.vmem [#allocation17], %s5767_s23 }
  0xa0   : > { %4146 = dma.hbm_to_vmem [thread:$0]  (!%p5242_p4), %s558_s30, 4096, %s560_s7, %s5097_s10, %s4843_s3, %s5764_s15, %s5763_s2  }
  0xa1   : > { %s5766_s9 = smov %s5765_s18  ;;  %s579_s26 = scalar_lea.hbm %s5765_s18, %s5832_s0 }
  0xa2   : > { %4130 = dma.hbm_to_vmem [thread:$0]  (!%p5040_p11), %s424_s1, 4096, %s426_s13, [#allocation13], %s5731_s21, %s5731_s21, %s5730_s20  }
  0xa3   : > { %s581_s22 = sshll.u32 %s579_s26, 4  ;;  %s583_s16 = sshll.u32 %s572_s5, 4  ;;  %s582_s22 = int_to_ptr.hbm [resolvable:$true] %s581_s22  ;;  %s584_s16 = int_to_ptr.vmem [resolvable:$true] %s583_s16 }
  0xa4   : > { %s4548_s11 = sshra.s32 %s582_s22, 4  ;;  %s4555_s7 = scalar_lea.hbm %s5766_s9, 4  ;;  %s4549_s11 = int_to_ptr.hbm [resolvable:$true] %s4548_s11 }
  0xa5   : > { %s4550_s30 = scalar_lea.hbm %s4549_s11, 1 }
  0xa6   : > { %p4551_p10 = scmp.ne.s32.totalorder %s4549_s11, %s4550_s30  ;;  %p4557_p6 = scmp.lt.s32.totalorder %s4555_s7, %s4550_s30 }
  0xa8   : > { %p4553_p13 = pnand %p4552_p12, %p4551_p10 }
  0xaa   : > { %p4554_p3 = pneg %p4553_p13 }
  0xac   : > { %p4559_p11 = pnand %p4557_p6, %p4554_p3 }
  0xae   : > { %4562 = shalt.err (!%p4559_p11)
}
  0xaf   : > { %4149 = dma.hbm_to_vmem [thread:$0]  (!%p5154_p2), %s582_s22, 16, %s584_s16, %s5109_s19  }
  0xb0   : > { %s5768_s21 = sld [smem:[#allocation70_spill]]  ;;  %s5769_s3 = sand.u32 1, %s5748_s4  }
  0xb1   : > { %s593_s2 = scalar_lea.vmem [#allocation18], %s5769_s3  ;;  %s5771_s8 = sld [smem:[#allocation45_spill]] (!%p5029_p9) }
  0xb2   : > { %s605_s15 = sshll.u32 %s593_s2, 4  ;;  %s5772_s13 = sld [smem:[#allocation38_spill]] (!%p5029_p9)  ;;  %s606_s15 = int_to_ptr.vmem [resolvable:$true] %s605_s15 }
  0xb4   : > { %614 = sbr.rel (%p5029_p9) target bundleno = 1128 (0x468), region = 64 }
  0xb6   : > { %s601_s1 = scalar_lea.hbm %s5768_s21, %s5846_s12 }
  0xb7   : > { %s603_s26 = sshll.u32 %s601_s1, 4  ;;  %s616_s29 = sand.u32 (!%p5029_p9), 1, %s5771_s8   ;;  %s604_s26 = int_to_ptr.hbm [resolvable:$true] %s603_s26 }
  0xb8   : > { %4152 = dma.hbm_to_vmem [thread:$0]  (!%p5242_p4), %s604_s26, 16, %s606_s15, %s5097_s10  }
  0xb9   : > { %s618_s19 = sand.u32 1, %s5772_s13   ;;  %s5286_s18 = scalar_lea.sflag [#allocation7], %s616_s29 }
  0xba   : > { %s3017_s16 = sshll.u32 %s618_s19, 5 }
  0xbb   : > { %s5288_s12 = scalar_lea.vmem [#allocation6], %s3017_s16 }
  0xbc   : > { %4717 = dma.done.wait (%p5069_p7), %s5286_s18, 512  }
  0xbd   : > { %4719 = vsyncadd (%p5069_p7), %s5286_s18, 4294966784  ;;  %s5296_s10 = sshll.u32 %s618_s19, 4  ;;  %s627_s4 = scalar_lea.sflag [#allocation10], %s616_s29 }
  0xbe   : > { %s630_s6 = scalar_lea.vmem [#allocation9], %s5296_s10 }
  0xbf   : > { %4721 = dma.done.wait (%p5069_p7), %s627_s4, 256  }
  0xc0   : > { %4723 = vsyncadd (%p5069_p7), %s627_s4, 4294967040  ;;  %p5774_p9 = scmp.eq.s32.totalorder %s5771_s8, 0 }
  0xc2   : > { %4725 = dma.done.wait (%p5774_p9), [#allocation10], 8192   ;;  %p5775_p2 = pmov %p5774_p9 }
  0xc4   : > { %4727 = vsyncadd (%p5775_p2), [#allocation10], 4294959104  ;;  %p5776_p1 = pmov %p5775_p2 }
  0xc6   : > { %4729 = dma.done.wait (%p5776_p1), [#allocation13], 4096   ;;  %p5777_p0 = pmov %p5776_p1 }
  0xc7   : > { %s5778_s22 = sld [smem:[#allocation54_spill]]  ;;  %s648_s23 = sand.u32 1, %s4798_s27  }
  0xc8   : > { %4731 = vsyncadd (%p5777_p0), [#allocation13], 4294963200  ;;  %s3021_s5 = sshll.u32 %s648_s23, 8 }
  0xc9   : > { %s5312_s30 = scalar_lea.vmem [#allocation14], %s3021_s5 }
  0xcd   : > { %p5779_p7 = scmp.ne.s32.totalorder %s5778_s22, 0 }
  0xcf   : > { %4733 = dma.done.wait (%p5779_p7), %s5286_s18, 4096  }
  0xd0   : > { %4735 = vsyncadd (%p5779_p7), %s5286_s18, 4294963200  ;;  %s5780_s0 = sld [smem:[#allocation36_spill]] }
  0xd6   : > { %s658_s7 = sand.u32 1, %s5780_s0  }
  0xd7   : > { %s3022_s11 = sshll.u32 %s658_s7, 8 }
  0xd8   : > { %s5321_s20 = scalar_lea.vmem [#allocation15], %s3022_s11 }
  0xd9   : > { %4737 = dma.done.wait (%p5179_p8), %s627_s4, 4096  }
  0xda   : > { %4739 = vsyncadd (%p5179_p8), %s627_s4, 4294963200  ;;  %s5782_s21 = sld [smem:[#allocation34_spill]] }
  0xe0   : > { %s668_s1 = sand.u32 1, %s5782_s21  }
  0xe1   : > { %s3023_s26 = sshll.u32 %s668_s1, 8 }
  0xe2   : > { %s5328_s3 = scalar_lea.vmem [#allocation16], %s3023_s26 }
  0xe3   : > { %4741 = dma.done.wait (%p5218_p5), %s5286_s18, 4096  }
  0xe4   : > { %4743 = vsyncadd (%p5218_p5), %s5286_s18, 4294963200  ;;  %s5336_s2 = scalar_lea.vmem [#allocation17], %s648_s23 }
  0xe5   : > { %4745 = dma.done.wait (%p5779_p7), %s627_s4, 16  }
  0xe6   : > { %4747 = vsyncadd (%p5779_p7), %s627_s4, 4294967280  ;;  %s5342_s15 = scalar_lea.vmem [#allocation18], %s668_s1 }
  0xe7   : > { %4749 = dma.done.wait (%p5218_p5), %s5286_s18, 16  }
  0xe8   : > { %4751 = vsyncadd (%p5218_p5), %s5286_s18, 4294967280  ;;  %s5783_s25 = sld [smem:[#allocation31_spill]] }
  0xe9   : > { %s5784_s29 = sld [smem:[#allocation40_spill]] }
  0xee   : > { %s753_s8 = sand.u32 1, %s5783_s25  }
  0xef   : > { %s3024_s13 = sshll.u32 %s753_s8, 4  ;;  %p3025_p8 = scmp.ne.s32.totalorder %s5784_s29, 0 }
  0xf0   : > { %s5353_s24 = scalar_lea.vmem [#allocation19], %s3024_s13  ;;  %s5785_s16 = sld [smem:[#allocation67_spill]] (!%p3025_p8) }
  0xf1   : > { %791 = sbr.rel (%p3025_p8) target bundleno = 497 (0x1f1), region = 104 }
  0xf6   : > { %v3140_v0 = vld [vmem:[#allocation12 + $0xe0] sm:$0xf]  ;;  %v3983_v1 = vld [vmem:[#allocation12 + $0xec] sm:$0xf0]  ;;  %v3981_v2 = vld [vmem:[#allocation12 + $0xe4] sm:$0xf] }
  0xf7   : > { %v3141_v3 = vor.u32 %v3983_v1, %v3140_v0  ;;  %v3142_v4 = vld [vmem:[#allocation12 + $0xf0] sm:$0xf0]  ;;  %v3148_v5 = vld [vmem:[#allocation12 + $0xe8] sm:$0xf]  ;;  %v3984_v6 = vld [vmem:[#allocation12 + $0xf4] sm:$0xf0] }
  0xf8   : > { %v3145_v7 = vor.u32 %v3981_v2, %v3142_v4  ;;  %v3149_v8 = vor.u32 %v3984_v6, %v3148_v5  ;;  %v3982_v9 = vld [vmem:[#allocation12 + $0xec] sm:$0xf]  ;;  %v3150_v10 = vld [vmem:[#allocation12 + $0xf8] sm:$0xf0]  ;;  %v3124_v11 = vld [vmem:[#allocation12 + $0xc0] sm:$0xf] }
  0xf9   : > { %1057 = vmatpush.bf16.msra.mxu0 %v3141_v3  ;;  %v3153_v12 = vor.u32 %v3982_v9, %v3150_v10  ;;  %v3979_v13 = vld [vmem:[#allocation12 + $0xcc] sm:$0xf0]  ;;  %v3977_v14 = vld [vmem:[#allocation12 + $0xc4] sm:$0xf]  ;;  %v3126_v15 = vld [vmem:[#allocation12 + $0xd0] sm:$0xf0] }
  0xfa   : > { %1071 = vmatpush.bf16.msra.mxu1 %v3145_v7  ;;  %1085 = vmatpush.bf16.msra.mxu2 %v3149_v8  ;;  %v3125_v16 = vor.u32 %v3979_v13, %v3124_v11  ;;  %v3129_v17 = vor.u32 %v3977_v14, %v3126_v15  ;;  %v3132_v18 = vld [vmem:[#allocation12 + $0xc8] sm:$0xf]  ;;  %v3980_v19 = vld [vmem:[#allocation12 + $0xd4] sm:$0xf0]  ;;  %v3978_v20 = vld [vmem:[#allocation12 + $0xcc] sm:$0xf] }
  0xfb   : > { %1099 = vmatpush.bf16.msra.mxu3 %v3153_v12  ;;  %v3133_v21 = vor.u32 %v3980_v19, %v3132_v18  ;;  %v3134_v22 = vld [vmem:[#allocation12 + $0xd8] sm:$0xf0]  ;;  %v3108_v23 = vld [vmem:[#allocation12 + $0xa0] sm:$0xf]  ;;  %v3975_v24 = vld [vmem:[#allocation12 + $0xac] sm:$0xf0] }
  0xfc   : > { %v3137_v25 = vor.u32 %v3978_v20, %v3134_v22  ;;  %v3973_v26 = vld [vmem:[#allocation12 + $0xa4] sm:$0xf]  ;;  %v3110_v27 = vld [vmem:[#allocation12 + $0xb0] sm:$0xf0]  ;;  %v3116_v28 = vld [vmem:[#allocation12 + $0xa8] sm:$0xf]  ;;  %v3109_v29 = vor.u32 %v3975_v24, %v3108_v23 }
  0xfd   : > { %1058 = vmatpush.bf16.msra.mxu0 %v3125_v16  ;;  %v3976_v30 = vld [vmem:[#allocation12 + $0xb4] sm:$0xf0]  ;;  %v3974_v31 = vld [vmem:[#allocation12 + $0xac] sm:$0xf]  ;;  %v3118_v32 = vld [vmem:[#allocation12 + $0xb8] sm:$0xf0]  ;;  %v3113_v33 = vor.u32 %v3973_v26, %v3110_v27 }
  0xfe   : > { %1072 = vmatpush.bf16.msra.mxu1 %v3129_v17  ;;  %1086 = vmatpush.bf16.msra.mxu2 %v3133_v21  ;;  %v3117_v34 = vor.u32 %v3976_v30, %v3116_v28  ;;  %v3092_v35 = vld [vmem:[#allocation12 + $0x80] sm:$0xf]  ;;  %v3971_v36 = vld [vmem:[#allocation12 + $0x8c] sm:$0xf0]  ;;  %v3969_v37 = vld [vmem:[#allocation12 + $0x84] sm:$0xf]  ;;  %v3121_v38 = vor.u32 %v3974_v31, %v3118_v32 }
  0xff   : > { %1100 = vmatpush.bf16.msra.mxu3 %v3137_v25  ;;  %v3094_v39 = vld [vmem:[#allocation12 + $0x90] sm:$0xf0]  ;;  %v3100_v40 = vld [vmem:[#allocation12 + $0x88] sm:$0xf]  ;;  %v3972_v41 = vld [vmem:[#allocation12 + $0x94] sm:$0xf0]  ;;  %v3093_v44 = vor.u32 %v3971_v36, %v3092_v35 }
 0x100   : > { %v3970_v42 = vld [vmem:[#allocation12 + $0x8c] sm:$0xf]  ;;  %v3102_v43 = vld [vmem:[#allocation12 + $0x98] sm:$0xf0]  ;;  %v3097_v45 = vor.u32 %v3969_v37, %v3094_v39  ;;  %v3101_v46 = vor.u32 %v3972_v41, %v3100_v40  ;;  %v3076_v47 = vld [vmem:[#allocation12 + $0x60] sm:$0xf] }
 0x101   : > { %1059 = vmatpush.bf16.msra.mxu0 %v3109_v29  ;;  %v3967_v48 = vld [vmem:[#allocation12 + $0x6c] sm:$0xf0]  ;;  %v3965_v49 = vld [vmem:[#allocation12 + $0x64] sm:$0xf]  ;;  %v3105_v50 = vor.u32 %v3970_v42, %v3102_v43  ;;  %v3078_v51 = vld [vmem:[#allocation12 + $0x70] sm:$0xf0] }
 0x102   : > { %1073 = vmatpush.bf16.msra.mxu1 %v3113_v33  ;;  %1087 = vmatpush.bf16.msra.mxu2 %v3117_v34  ;;  %v3084_v52 = vld [vmem:[#allocation12 + $0x68] sm:$0xf]  ;;  %v3968_v53 = vld [vmem:[#allocation12 + $0x74] sm:$0xf0]  ;;  %v3966_v54 = vld [vmem:[#allocation12 + $0x6c] sm:$0xf]  ;;  %v3077_v56 = vor.u32 %v3967_v48, %v3076_v47  ;;  %v3081_v57 = vor.u32 %v3965_v49, %v3078_v51 }
 0x103   : > { %1101 = vmatpush.bf16.msra.mxu3 %v3121_v38  ;;  %v3086_v55 = vld [vmem:[#allocation12 + $0x78] sm:$0xf0]  ;;  %v3085_v58 = vor.u32 %v3968_v53, %v3084_v52  ;;  %v3060_v59 = vld [vmem:[#allocation12 + $0x40] sm:$0xf]  ;;  %v3963_v60 = vld [vmem:[#allocation12 + $0x4c] sm:$0xf0] }
 0x104   : > { %v3961_v61 = vld [vmem:[#allocation12 + $0x44] sm:$0xf]  ;;  %v3089_v62 = vor.u32 %v3966_v54, %v3086_v55  ;;  %v3062_v63 = vld [vmem:[#allocation12 + $0x50] sm:$0xf0]  ;;  %v3068_v0 = vld [vmem:[#allocation12 + $0x48] sm:$0xf]  ;;  %v3061_v4 = vor.u32 %v3963_v60, %v3060_v59 }
 0x105   : > { %1060 = vmatpush.bf16.msra.mxu0 %v3093_v44  ;;  %v3964_v1 = vld [vmem:[#allocation12 + $0x54] sm:$0xf0]  ;;  %v3962_v2 = vld [vmem:[#allocation12 + $0x4c] sm:$0xf]  ;;  %v3070_v3 = vld [vmem:[#allocation12 + $0x58] sm:$0xf0]  ;;  %v3065_v5 = vor.u32 %v3961_v61, %v3062_v63 }
 0x106   : > { %1074 = vmatpush.bf16.msra.mxu1 %v3097_v45  ;;  %1088 = vmatpush.bf16.msra.mxu2 %v3101_v46  ;;  %v3069_v6 = vor.u32 %v3964_v1, %v3068_v0  ;;  %v3044_v7 = vld [vmem:[#allocation12 + $0x20] sm:$0xf]  ;;  %v3959_v8 = vld [vmem:[#allocation12 + $0x2c] sm:$0xf0]  ;;  %v3957_v9 = vld [vmem:[#allocation12 + $0x24] sm:$0xf]  ;;  %v3073_v10 = vor.u32 %v3962_v2, %v3070_v3 }
 0x107   : > { %1102 = vmatpush.bf16.msra.mxu3 %v3105_v50  ;;  %v3046_v11 = vld [vmem:[#allocation12 + $0x30] sm:$0xf0]  ;;  %v3052_v12 = vld [vmem:[#allocation12 + $0x28] sm:$0xf]  ;;  %v3960_v13 = vld [vmem:[#allocation12 + $0x34] sm:$0xf0]  ;;  %v3045_v16 = vor.u32 %v3959_v8, %v3044_v7 }
 0x108   : > { %v3958_v14 = vld [vmem:[#allocation12 + $0x2c] sm:$0xf]  ;;  %v3054_v15 = vld [vmem:[#allocation12 + $0x38] sm:$0xf0]  ;;  %v3028_v17 = vld [vmem:[#allocation12] sm:$0xf]  ;;  %v3049_v19 = vor.u32 %v3957_v9, %v3046_v11  ;;  %v3053_v20 = vor.u32 %v3960_v13, %v3052_v12 }
 0x109   : > { %1061 = vmatpush.bf16.msra.mxu0 %v3077_v56  ;;  %v3955_v18 = vld [vmem:[#allocation12 + $0xc] sm:$0xf0]  ;;  %v3953_v21 = vld [vmem:[#allocation12 + $0x4] sm:$0xf]  ;;  %v3030_v22 = vld [vmem:[#allocation12 + $0x10] sm:$0xf0]  ;;  %v3057_v24 = vor.u32 %v3958_v14, %v3054_v15 }
 0x10a   : > { %1075 = vmatpush.bf16.msra.mxu1 %v3081_v57  ;;  %1089 = vmatpush.bf16.msra.mxu2 %v3085_v58  ;;  %v3036_v23 = vld [vmem:[#allocation12 + $0x8] sm:$0xf]  ;;  %v3956_v25 = vld [vmem:[#allocation12 + $0x14] sm:$0xf0]  ;;  %v3954_v26 = vld [vmem:[#allocation12 + $0xc] sm:$0xf]  ;;  %v3029_v31 = vor.u32 %v3955_v18, %v3028_v17  ;;  %v3033_v35 = vor.u32 %v3953_v21, %v3030_v22 }
 0x10b   : > { %1103 = vmatpush.bf16.msra.mxu3 %v3089_v62  ;;  %v3038_v27 = vld [vmem:[#allocation12 + $0x18] sm:$0xf0]  ;;  %v3268_v28 = vld [vmem:[#allocation11 + $0xe0] sm:$0xf]  ;;  %v3919_v29 = vld [vmem:[#allocation11 + $0xec] sm:$0xf0]  ;;  %v3037_v36 = vor.u32 %v3956_v25, %v3036_v23 }
 0x10c   : > { %v3396_v30 = vld [vmem:[#allocation11 + $0x1e0] sm:$0xf]  ;;  %v3951_v32 = vld [vmem:[#allocation11 + $0x1ec] sm:$0xf0]  ;;  %v3917_v33 = vld [vmem:[#allocation11 + $0xe4] sm:$0xf]  ;;  %v3041_v39 = vor.u32 %v3954_v26, %v3038_v27  ;;  %v3269_v40 = vor.u32 %v3919_v29, %v3268_v28 }
 0x10d   : > { %1062 = vmatpush.bf16.msra.mxu0 %v3061_v4  ;;  %v3270_v34 = vld [vmem:[#allocation11 + $0xf0] sm:$0xf0]  ;;  %v3949_v37 = vld [vmem:[#allocation11 + $0x1e4] sm:$0xf]  ;;  %v3252_v41 = vld [vmem:[#allocation11 + $0xc0] sm:$0xf]  ;;  %v3397_v42 = vor.u32 %v3951_v32, %v3396_v30 }
 0x10e   : > { %1076 = vmatpush.bf16.msra.mxu1 %v3065_v5  ;;  %1090 = vmatpush.bf16.msra.mxu2 %v3069_v6  ;;  %v3398_v38 = vld [vmem:[#allocation11 + $0x1f0] sm:$0xf0]  ;;  %v3273_v43 = vor.u32 %v3917_v33, %v3270_v34  ;;  %v3915_v44 = vld [vmem:[#allocation11 + $0xcc] sm:$0xf0]  ;;  %v3380_v45 = vld [vmem:[#allocation11 + $0x1c0] sm:$0xf] }
 0x10f   : > { %1104 = vmatpush.bf16.msra.mxu3 %v3073_v10  ;;  %v3947_v46 = vld [vmem:[#allocation11 + $0x1cc] sm:$0xf0]  ;;  %v3401_v47 = vor.u32 %v3949_v37, %v3398_v38  ;;  %v3913_v48 = vld [vmem:[#allocation11 + $0xc4] sm:$0xf]  ;;  %v3254_v49 = vld [vmem:[#allocation11 + $0xd0] sm:$0xf0]  ;;  %v3253_v54 = vor.u32 %v3915_v44, %v3252_v41 }
 0x110   : > { %v3945_v50 = vld [vmem:[#allocation11 + $0x1c4] sm:$0xf]  ;;  %v3382_v51 = vld [vmem:[#allocation11 + $0x1d0] sm:$0xf0]  ;;  %v863_v53 = vld [vmem:[%s630_s6 + $0x8] sm:$0xff]  ;;  %v3381_v56 = vor.u32 %v3947_v46, %v3380_v45  ;;  %v3257_v57 = vor.u32 %v3913_v48, %v3254_v49 }
 0x111   : > { %1063 = vmatpush.bf16.msra.mxu0 %v3045_v16  ;;  %v862_v52 = vld [vmem:[%s630_s6] sm:$0xff]  ;;  %v3385_v61 = vor.u32 %v3945_v50, %v3382_v51 }
 0x112   : > { %1077 = vmatpush.bf16.msra.mxu1 %v3049_v19  ;;  %1091 = vmatpush.bf16.msra.mxu2 %v3053_v20  ;;  %v864_v55 = vpack.c.bf16 %v863_v53, %v862_v52  ;;  %v3236_v58 = vld [vmem:[#allocation11 + $0xa0] sm:$0xf]  ;;  %v3911_v59 = vld [vmem:[#allocation11 + $0xac] sm:$0xf0]  ;;  %v3909_v63 = vld [vmem:[#allocation11 + $0xa4] sm:$0xf] }
 0x113   : > { %1105 = vmatpush.bf16.msra.mxu3 %v3057_v24  ;;  %v3364_v60 = vld [vmem:[#allocation11 + $0x1a0] sm:$0xf]  ;;  %v3943_v62 = vld [vmem:[#allocation11 + $0x1ac] sm:$0xf0]  ;;  %v3238_v0 = vld [vmem:[#allocation11 + $0xb0] sm:$0xf0]  ;;  %v3237_v3 = vor.u32 %v3911_v59, %v3236_v58 }
 0x114   : > { %v3941_v1 = vld [vmem:[#allocation11 + $0x1a4] sm:$0xf]  ;;  %v3366_v2 = vld [vmem:[#allocation11 + $0x1b0] sm:$0xf0]  ;;  %v3365_v4 = vor.u32 %v3943_v62, %v3364_v60  ;;  %v3241_v5 = vor.u32 %v3909_v63, %v3238_v0  ;;  %v3220_v6 = vld [vmem:[#allocation11 + $0x80] sm:$0xf] }
 0x115   : > { %1064 = vmatpush.bf16.msra.mxu0 %v3029_v31  ;;  %v3907_v7 = vld [vmem:[#allocation11 + $0x8c] sm:$0xf0]  ;;  %v3348_v8 = vld [vmem:[#allocation11 + $0x180] sm:$0xf]  ;;  %v3369_v9 = vor.u32 %v3941_v1, %v3366_v2  ;;  %v3905_v11 = vld [vmem:[#allocation11 + $0x84] sm:$0xf] }
 0x116   : > { %1078 = vmatpush.bf16.msra.mxu1 %v3033_v35  ;;  %1092 = vmatpush.bf16.msra.mxu2 %v3037_v36  ;;  %v3939_v10 = vld [vmem:[#allocation11 + $0x18c] sm:$0xf0]  ;;  %v3222_v12 = vld [vmem:[#allocation11 + $0x90] sm:$0xf0]  ;;  %v3937_v13 = vld [vmem:[#allocation11 + $0x184] sm:$0xf]  ;;  %v3221_v15 = vor.u32 %v3907_v7, %v3220_v6 }
 0x117   : > { %1106 = vmatpush.bf16.msra.mxu3 %v3041_v39  ;;  %v3350_v14 = vld [vmem:[#allocation11 + $0x190] sm:$0xf0]  ;;  %v3349_v16 = vor.u32 %v3939_v10, %v3348_v8  ;;  %v3225_v17 = vor.u32 %v3905_v11, %v3222_v12  ;;  %v3204_v18 = vld [vmem:[#allocation11 + $0x60] sm:$0xf]  ;;  %v3903_v19 = vld [vmem:[#allocation11 + $0x6c] sm:$0xf0] }
 0x118   : > { %1065 = vmatmul.bf16.vlgmr.msra.gmra.mxu0 %v864_v55  ;;  %v3332_v20 = vld [vmem:[#allocation11 + $0x160] sm:$0xf]  ;;  %v3353_v21 = vor.u32 %v3937_v13, %v3350_v14  ;;  %v3935_v22 = vld [vmem:[#allocation11 + $0x16c] sm:$0xf0]  ;;  %v3901_v23 = vld [vmem:[#allocation11 + $0x64] sm:$0xf]  ;;  %v3205_v27 = vor.u32 %v3903_v19, %v3204_v18 }
 0x119   : > { %1433 = vmatpush.bf16.msrb.mxu0 %v3269_v40  ;;  %1093 = vmatmul.bf16.vlgmr.msra.gmra.mxu2 %v864_v55  ;;  %v3206_v24 = vld [vmem:[#allocation11 + $0x70] sm:$0xf0]  ;;  %v3933_v25 = vld [vmem:[#allocation11 + $0x164] sm:$0xf]  ;;  %v3333_v28 = vor.u32 %v3935_v22, %v3332_v20  ;;  %v3188_v30 = vld [vmem:[#allocation11 + $0x40] sm:$0xf] }
 0x11a   : > { %1447 = vmatpush.bf16.msrb.mxu1 %v3397_v42  ;;  %1461 = vmatpush.bf16.msrb.mxu2 %v3273_v43  ;;  %v3334_v26 = vld [vmem:[#allocation11 + $0x170] sm:$0xf0]  ;;  %v3209_v29 = vor.u32 %v3901_v23, %v3206_v24  ;;  %v3899_v31 = vld [vmem:[#allocation11 + $0x4c] sm:$0xf0]  ;;  %v3316_v32 = vld [vmem:[#allocation11 + $0x140] sm:$0xf] }
 0x11b   : > { %1475 = vmatpush.bf16.msrb.mxu3 %v3401_v47  ;;  %1079 = vmatmul.bf16.vlgmr.msra.gmra.mxu1 %v864_v55  ;;  %v3337_v33 = vor.u32 %v3933_v25, %v3334_v26  ;;  %v3931_v34 = vld [vmem:[#allocation11 + $0x14c] sm:$0xf0]  ;;  %v3897_v35 = vld [vmem:[#allocation11 + $0x44] sm:$0xf]  ;;  %v3190_v36 = vld [vmem:[#allocation11 + $0x50] sm:$0xf0]  ;;  %v3189_v39 = vor.u32 %v3899_v31, %v3188_v30 }
 0x11c   : > { %1107 = vmatmul.bf16.vlgmr.msra.gmra.mxu3 %v864_v55  ;;  %v3929_v37 = vld [vmem:[#allocation11 + $0x144] sm:$0xf]  ;;  %v3318_v38 = vld [vmem:[#allocation11 + $0x150] sm:$0xf0]  ;;  %v3317_v40 = vor.u32 %v3931_v34, %v3316_v32  ;;  %v3193_v41 = vor.u32 %v3897_v35, %v3190_v36  ;;  %v3172_v42 = vld [vmem:[#allocation11 + $0x20] sm:$0xf] }
 0x11d   : > { %1434 = vmatpush.bf16.msrb.mxu0 %v3253_v54  ;;  %v3895_v43 = vld [vmem:[#allocation11 + $0x2c] sm:$0xf0]  ;;  %v3300_v44 = vld [vmem:[#allocation11 + $0x120] sm:$0xf]  ;;  %v3321_v45 = vor.u32 %v3929_v37, %v3318_v38  ;;  %v3893_v47 = vld [vmem:[#allocation11 + $0x24] sm:$0xf] }
 0x11e   : > { %1448 = vmatpush.bf16.msrb.mxu1 %v3381_v56  ;;  %1462 = vmatpush.bf16.msrb.mxu2 %v3257_v57  ;;  %v3927_v46 = vld [vmem:[#allocation11 + $0x12c] sm:$0xf0]  ;;  %v3174_v48 = vld [vmem:[#allocation11 + $0x30] sm:$0xf0]  ;;  %v3925_v49 = vld [vmem:[#allocation11 + $0x124] sm:$0xf]  ;;  %v3173_v51 = vor.u32 %v3895_v43, %v3172_v42 }
 0x11f   : > { %1476 = vmatpush.bf16.msrb.mxu3 %v3385_v61  ;;  %v3302_v50 = vld [vmem:[#allocation11 + $0x130] sm:$0xf0]  ;;  %v3156_v52 = vld [vmem:[#allocation11] sm:$0xf]  ;;  %v3891_v53 = vld [vmem:[#allocation11 + $0xc] sm:$0xf0]  ;;  %v3301_v55 = vor.u32 %v3927_v46, %v3300_v44  ;;  %v3177_v56 = vor.u32 %v3893_v47, %v3174_v48 }
 0x120   : > { %v3284_v54 = vld [vmem:[#allocation11 + $0x100] sm:$0xf]  ;;  %v3923_v57 = vld [vmem:[#allocation11 + $0x10c] sm:$0xf0]  ;;  %v3889_v58 = vld [vmem:[#allocation11 + $0x4] sm:$0xf]  ;;  %v3305_v60 = vor.u32 %v3925_v49, %v3302_v50 }
 0x121   : > { %1435 = vmatpush.bf16.msrb.mxu0 %v3237_v3  ;;  %v3158_v59 = vld [vmem:[#allocation11 + $0x10] sm:$0xf0]  ;;  %v3921_v61 = vld [vmem:[#allocation11 + $0x104] sm:$0xf]  ;;  %v3276_v63 = vld [vmem:[#allocation11 + $0xe8] sm:$0xf]  ;;  %v3157_v3 = vor.u32 %v3891_v53, %v3156_v52  ;;  %v3285_v7 = vor.u32 %v3923_v57, %v3284_v54 }
 0x122   : > { %1449 = vmatpush.bf16.msrb.mxu1 %v3365_v4  ;;  %1463 = vmatpush.bf16.msrb.mxu2 %v3241_v5  ;;  %v3286_v62 = vld [vmem:[#allocation11 + $0x110] sm:$0xf0]  ;;  %v3920_v0 = vld [vmem:[#allocation11 + $0xf4] sm:$0xf0]  ;;  %v3404_v1 = vld [vmem:[#allocation11 + $0x1e8] sm:$0xf]  ;;  %v3161_v8 = vor.u32 %v3889_v58, %v3158_v59 }
 0x123   : > { %1477 = vmatpush.bf16.msrb.mxu3 %v3369_v9  ;;  %v3952_v2 = vld [vmem:[#allocation11 + $0x1f4] sm:$0xf0]  ;;  %v3918_v4 = vld [vmem:[#allocation11 + $0xec] sm:$0xf]  ;;  %v3278_v5 = vld [vmem:[#allocation11 + $0xf8] sm:$0xf0]  ;;  %v3289_v12 = vor.u32 %v3921_v61, %v3286_v62  ;;  %v3277_v13 = vor.u32 %v3920_v0, %v3276_v63 }
 0x124   : > { %v3950_v6 = vld [vmem:[#allocation11 + $0x1ec] sm:$0xf]  ;;  %v3406_v9 = vld [vmem:[#allocation11 + $0x1f8] sm:$0xf0]  ;;  %v792_v10 = vld [vmem:[%s5288_s12] sm:$0xff] }
 0x125   : > { %1436 = vmatpush.bf16.msrb.mxu0 %v3221_v15  ;;  %v794_v11 = vld [vmem:[%s5288_s12 + $0x10] sm:$0xff]  ;;  %v793_v14 = vld [vmem:[%s5288_s12 + $0x8] sm:$0xff]  ;;  %v795_v15 = vld [vmem:[%s5288_s12 + $0x18] sm:$0xff] }
 0x126   : > { %1450 = vmatpush.bf16.msrb.mxu1 %v3349_v16  ;;  %1464 = vmatpush.bf16.msrb.mxu2 %v3225_v17  ;;  %v3405_v16 = vor.u32 %v3952_v2, %v3404_v1  ;;  %v3281_v17 = vor.u32 %v3918_v4, %v3278_v5  ;;  %v3260_v18 = vld [vmem:[#allocation11 + $0xc8] sm:$0xf]  ;;  %v3916_v19 = vld [vmem:[#allocation11 + $0xd4] sm:$0xf0]  ;;  %v5364_v22 = vpack.c.bf16 %v794_v11, %v792_v10  ;;  %v3914_v24 = vld [vmem:[#allocation11 + $0xcc] sm:$0xf] }
 0x127   : > { %1478 = vmatpush.bf16.msrb.mxu3 %v3353_v21  ;;  %v3388_v20 = vld [vmem:[#allocation11 + $0x1c8] sm:$0xf]  ;;  %v3409_v21 = vor.u32 %v3950_v6, %v3406_v9  ;;  %v3948_v23 = vld [vmem:[#allocation11 + $0x1d4] sm:$0xf0]  ;;  %v3262_v25 = vld [vmem:[#allocation11 + $0xd8] sm:$0xf0]  ;;  %v5366_v26 = vpack.c.bf16 %v795_v15, %v793_v14 }
 0x128   : > { %v3389_v30 = vor.u32 %v3948_v23, %v3388_v20  ;;  %v3265_v31 = vor.u32 %v3914_v24, %v3262_v25  ;;  %v3244_v32 = vld [vmem:[#allocation11 + $0xa8] sm:$0xf]  ;;  %v3944_v36 = vld [vmem:[#allocation11 + $0x1b4] sm:$0xf0]  ;;  %v3910_v37 = vld [vmem:[#allocation11 + $0xac] sm:$0xf] }
 0x129   : > { %1437 = vmatpush.bf16.msrb.mxu0 %v3205_v27  ;;  %v3946_v27 = vld [vmem:[#allocation11 + $0x1cc] sm:$0xf]  ;;  %v3372_v34 = vld [vmem:[#allocation11 + $0x1a8] sm:$0xf]  ;;  %v3246_v38 = vld [vmem:[#allocation11 + $0xb8] sm:$0xf0] }
 0x12a   : > { %1451 = vmatpush.bf16.msrb.mxu1 %v3333_v28  ;;  %1465 = vmatpush.bf16.msrb.mxu2 %v3209_v29  ;;  %v3390_v28 = vld [vmem:[#allocation11 + $0x1d8] sm:$0xf0]  ;;  %v3261_v29 = vor.u32 %v3916_v19, %v3260_v18  ;;  %v3373_v42 = vor.u32 %v3944_v36, %v3372_v34  ;;  %v3249_v43 = vor.u32 %v3910_v37, %v3246_v38  ;;  %v3228_v44 = vld [vmem:[#allocation11 + $0x88] sm:$0xf]  ;;  %v3940_v48 = vld [vmem:[#allocation11 + $0x194] sm:$0xf0] }
 0x12b   : > { %1479 = vmatpush.bf16.msrb.mxu3 %v3337_v33  ;;  %v3912_v33 = vld [vmem:[#allocation11 + $0xb4] sm:$0xf0]  ;;  %v3393_v35 = vor.u32 %v3946_v27, %v3390_v28  ;;  %v3356_v46 = vld [vmem:[#allocation11 + $0x188] sm:$0xf]  ;;  %v3906_v49 = vld [vmem:[#allocation11 + $0x8c] sm:$0xf] }
 0x12c   : > { %v3230_v50 = vld [vmem:[#allocation11 + $0x98] sm:$0xf0]  ;;  %v3357_v54 = vor.u32 %v3940_v48, %v3356_v46  ;;  %v3904_v57 = vld [vmem:[#allocation11 + $0x74] sm:$0xf0]  ;;  %v3340_v58 = vld [vmem:[#allocation11 + $0x168] sm:$0xf] }
 0x12d   : > { %1438 = vmatpush.bf16.msrb.mxu0 %v3189_v39  ;;  %v3942_v39 = vld [vmem:[#allocation11 + $0x1ac] sm:$0xf]  ;;  %v3358_v52 = vld [vmem:[#allocation11 + $0x198] sm:$0xf0]  ;;  %v3196_v4 = vld [vmem:[#allocation11 + $0x48] sm:$0xf] }
 0x12e   : > { %1452 = vmatpush.bf16.msrb.mxu1 %v3317_v40  ;;  %1466 = vmatpush.bf16.msrb.mxu2 %v3193_v41  ;;  %v3374_v40 = vld [vmem:[#allocation11 + $0x1b8] sm:$0xf0]  ;;  %v3245_v41 = vor.u32 %v3912_v33, %v3244_v32  ;;  %v3902_v61 = vld [vmem:[#allocation11 + $0x6c] sm:$0xf]  ;;  %v3900_v5 = vld [vmem:[#allocation11 + $0x54] sm:$0xf0] }
 0x12f   : > { %1480 = vmatpush.bf16.msrb.mxu3 %v3321_v45  ;;  %v3908_v45 = vld [vmem:[#allocation11 + $0x94] sm:$0xf0]  ;;  %v3377_v47 = vor.u32 %v3942_v39, %v3374_v40  ;;  %v3214_v62 = vld [vmem:[#allocation11 + $0x78] sm:$0xf0]  ;;  %v3934_v63 = vld [vmem:[#allocation11 + $0x16c] sm:$0xf] }
 0x130   : > { %v3229_v53 = vor.u32 %v3908_v45, %v3228_v44  ;;  %v3342_v0 = vld [vmem:[#allocation11 + $0x178] sm:$0xf0]  ;;  %v3324_v6 = vld [vmem:[#allocation11 + $0x148] sm:$0xf]  ;;  %v3898_v9 = vld [vmem:[#allocation11 + $0x4c] sm:$0xf] }
 0x131   : > { %1439 = vmatpush.bf16.msrb.mxu0 %v3173_v51  ;;  %v3938_v51 = vld [vmem:[#allocation11 + $0x18c] sm:$0xf]  ;;  %v3198_v10 = vld [vmem:[#allocation11 + $0x58] sm:$0xf0]  ;;  %v3308_v18 = vld [vmem:[#allocation11 + $0x128] sm:$0xf] }
 0x132   : > { %1453 = vmatpush.bf16.msrb.mxu1 %v3301_v55  ;;  %1467 = vmatpush.bf16.msrb.mxu2 %v3177_v56  ;;  %v3233_v55 = vor.u32 %v3906_v49, %v3230_v50  ;;  %v3212_v56 = vld [vmem:[#allocation11 + $0x68] sm:$0xf]  ;;  %v3361_v59 = vor.u32 %v3938_v51, %v3358_v52  ;;  %v3930_v11 = vld [vmem:[#allocation11 + $0x14c] sm:$0xf]  ;;  %v3201_v15 = vor.u32 %v3898_v9, %v3198_v10  ;;  %v3928_v20 = vld [vmem:[#allocation11 + $0x134] sm:$0xf0] }
 0x133   : > { %1481 = vmatpush.bf16.msrb.mxu3 %v3305_v60  ;;  %v3936_v60 = vld [vmem:[#allocation11 + $0x174] sm:$0xf0]  ;;  %v3213_v1 = vor.u32 %v3904_v57, %v3212_v56  ;;  %v3182_v23 = vld [vmem:[#allocation11 + $0x38] sm:$0xf0]  ;;  %v3926_v24 = vld [vmem:[#allocation11 + $0x12c] sm:$0xf]  ;;  %v3309_v28 = vor.u32 %v3928_v20, %v3308_v18 }
 0x134   : > { %v3341_v2 = vor.u32 %v3936_v60, %v3340_v58  ;;  %v3310_v25 = vld [vmem:[#allocation11 + $0x138] sm:$0xf0]  ;;  %v3292_v32 = vld [vmem:[#allocation11 + $0x108] sm:$0xf]  ;;  %v3924_v34 = vld [vmem:[#allocation11 + $0x114] sm:$0xf0] }
 0x135   : > { %1440 = vmatpush.bf16.msrb.mxu0 %v3157_v3  ;;  %v3217_v3 = vor.u32 %v3902_v61, %v3214_v62  ;;  %v3313_v33 = vor.u32 %v3926_v24, %v3310_v25  ;;  %v3166_v36 = vld [vmem:[#allocation11 + $0x18] sm:$0xf0]  ;;  %v3922_v37 = vld [vmem:[#allocation11 + $0x10c] sm:$0xf]  ;;  %v3293_v40 = vor.u32 %v3924_v34, %v3292_v32  ;;  %v4845_v18 = vmov 0.0  }
 0x136   : > { %1454 = vmatpush.bf16.msrb.mxu1 %v3285_v7  ;;  %1468 = vmatpush.bf16.msrb.mxu2 %v3161_v8  ;;  %v3345_v7 = vor.u32 %v3934_v63, %v3342_v0  ;;  %v3932_v8 = vld [vmem:[#allocation11 + $0x154] sm:$0xf0]  ;;  %v3294_v38 = vld [vmem:[#allocation11 + $0x118] sm:$0xf0]  ;;  %1595 = vst [vmem:[#allocation4 + $0x30] sm:$0xff] %v4845_v18 }
 0x137   : > { %1482 = vmatpush.bf16.msrb.mxu3 %v3289_v12  ;;  %v3326_v12 = vld [vmem:[#allocation11 + $0x158] sm:$0xf0]  ;;  %v3325_v14 = vor.u32 %v3932_v8, %v3324_v6  ;;  %1596 = vst [vmem:[#allocation4] sm:$0xff] %v4845_v18 }
 0x138   : > { %1441 = vmatmul.bf16.vlgmr.msrb.gmra.mxu0 %v5364_v22  ;;  %v3329_v19 = vor.u32 %v3930_v11, %v3326_v12  ;;  %1597 = vst [vmem:[#allocation4 + $0x18] sm:$0xff] %v4845_v18 }
 0x139   : > { %1489 = vmatpush.bf16.msra.mxu0 %v3277_v13  ;;  %1469 = vmatmul.bf16.vlgmr.msrb.gmra.mxu2 %v5364_v22  ;;  %v3197_v13 = vor.u32 %v3900_v5, %v3196_v4  ;;  %1598 = vst [vmem:[#allocation4 + $0x10] sm:$0xff] %v4845_v18 }
 0x13a   : > { %1503 = vmatpush.bf16.msra.mxu1 %v3405_v16  ;;  %1517 = vmatpush.bf16.msra.mxu2 %v3281_v17  ;;  %v3180_v16 = vld [vmem:[#allocation11 + $0x28] sm:$0xf]  ;;  %v3896_v17 = vld [vmem:[#allocation11 + $0x34] sm:$0xf0]  ;;  %1599 = vst [vmem:[#allocation4 + $0x8] sm:$0xff] %v4845_v18 }
 0x13b   : > { %1531 = vmatpush.bf16.msra.mxu3 %v3409_v21  ;;  %1455 = vmatmul.bf16.vlgmr.msrb.gmra.mxu1 %v5366_v26  ;;  %v3894_v21 = vld [vmem:[#allocation11 + $0x2c] sm:$0xf]  ;;  %v3181_v27 = vor.u32 %v3896_v17, %v3180_v16  ;;  %1600 = vst [vmem:[#allocation4 + $0x20] sm:$0xff] %v4845_v18 }
 0x13c   : > { %1483 = vmatmul.bf16.vlgmr.msrb.gmra.mxu3 %v5366_v26  ;;  %1601 = vst [vmem:[#allocation4 + $0x28] sm:$0xff] %v4845_v18 }
 0x13d   : > { %1490 = vmatpush.bf16.msra.mxu0 %v3261_v29  ;;  %v3185_v29 = vor.u32 %v3894_v21, %v3182_v23  ;;  %1602 = vst [vmem:[#allocation4 + $0x38] sm:$0xff] %v4845_v18 }
 0x13e   : > { %1504 = vmatpush.bf16.msra.mxu1 %v3389_v30  ;;  %1518 = vmatpush.bf16.msra.mxu2 %v3265_v31  ;;  %v3164_v30 = vld [vmem:[#allocation11 + $0x8] sm:$0xf]  ;;  %v3892_v31 = vld [vmem:[#allocation11 + $0x14] sm:$0xf0] }
 0x13f   : > { %1532 = vmatpush.bf16.msra.mxu3 %v3393_v35  ;;  %v3890_v35 = vld [vmem:[#allocation11 + $0xc] sm:$0xf]  ;;  %v3165_v39 = vor.u32 %v3892_v31, %v3164_v30 }
 0x141   : > { %1491 = vmatpush.bf16.msra.mxu0 %v3245_v41  ;;  %v3169_v41 = vor.u32 %v3890_v35, %v3166_v36 }
 0x142   : > { %1505 = vmatpush.bf16.msra.mxu1 %v3373_v42  ;;  %1519 = vmatpush.bf16.msra.mxu2 %v3249_v43  ;;  %v3297_v42 = vor.u32 %v3922_v37, %v3294_v38 }
 0x143   : > { %1533 = vmatpush.bf16.msra.mxu3 %v3377_v47 }
 0x145   : > { %1492 = vmatpush.bf16.msra.mxu0 %v3229_v53 }
 0x146   : > { %1506 = vmatpush.bf16.msra.mxu1 %v3357_v54  ;;  %1520 = vmatpush.bf16.msra.mxu2 %v3233_v55  ;;  %v5381_v54 = vld [vmem:[%s5785_s16] sm:$0xf] }
 0x147   : > { %1534 = vmatpush.bf16.msra.mxu3 %v3361_v59  ;;  %v1548_v60 = vperm.slane %v5381_v54, 1  ;;  %v1549_v24 = vperm.slane %v5381_v54, 2  ;;  %v1550_v30 = vperm.slane %v5381_v54, 3 }
 0x149   : > { %1493 = vmatpush.bf16.msra.mxu0 %v3213_v1 }
 0x14a   : > { %1507 = vmatpush.bf16.msra.mxu1 %v3341_v2  ;;  %1521 = vmatpush.bf16.msra.mxu2 %v3217_v3 }
 0x14b   : > { %1535 = vmatpush.bf16.msra.mxu3 %v3345_v7 }
 0x14d   : > { %1494 = vmatpush.bf16.msra.mxu0 %v3197_v13 }
 0x14e   : > { %1508 = vmatpush.bf16.msra.mxu1 %v3325_v14  ;;  %1522 = vmatpush.bf16.msra.mxu2 %v3201_v15 }
 0x14f   : > { %1536 = vmatpush.bf16.msra.mxu3 %v3329_v19 }
 0x151   : > { %1495 = vmatpush.bf16.msra.mxu0 %v3181_v27 }
 0x152   : > { %1509 = vmatpush.bf16.msra.mxu1 %v3309_v28  ;;  %1523 = vmatpush.bf16.msra.mxu2 %v3185_v29 }
 0x153   : > { %1537 = vmatpush.bf16.msra.mxu3 %v3313_v33 }
 0x155   : > { %1496 = vmatpush.bf16.msra.mxu0 %v3165_v39 }
 0x156   : > { %1510 = vmatpush.bf16.msra.mxu1 %v3293_v40  ;;  %1524 = vmatpush.bf16.msra.mxu2 %v3169_v41 }
 0x157   : > { %1538 = vmatpush.bf16.msra.mxu3 %v3297_v42 }
 0x158   : > { %1497 = vmatmul.bf16.vlgmr.msra.gmra.mxu0 %v5364_v22 }
 0x159   : > { %1511 = vmatmul.bf16.vlgmr.msra.gmra.mxu1 %v5366_v26  ;;  %1525 = vmatmul.bf16.vlgmr.msra.gmra.mxu2 %v5364_v22 }
 0x15a   : > { %1539 = vmatmul.bf16.vlgmr.msra.gmra.mxu3 %v5366_v26  ;;  %v1547_v26 = vperm.slane %v5381_v54, 0 }
 0x195   : > { %v1066_v43 = vpop.f32.mrf.mxu0 }
 0x198   : > { %v1080_v44 = vpop.f32.mrf.mxu1 }
 0x19c   : > { %v1094_v45 = vpop.f32.mrf.mxu2 }
 0x19d   : > { %v1068_v47 = vpop.f32.mrf.mxu0 }
 0x19f   : > { %v1108_v46 = vpop.f32.mrf.mxu3 }
 0x1a0   : > { %v1082_v48 = vpop.f32.mrf.mxu1 }
 0x1a4   : > { %v1096_v49 = vpop.f32.mrf.mxu2 }
 0x1a7   : > { %v5376_v50 = vpop.f32.mrf.mxu3 }
 0x1b5   : > { %v1442_v51 = vpop.f32.mrf.mxu0 }
 0x1b6   : > { %v1443_v52 = vadd.f32 %v1442_v51, %v1066_v43 }
 0x1b8   : > { %v1456_v53 = vpop.f32.mrf.mxu1 }
 0x1b9   : > { %v1457_v22 = vadd.f32 %v1456_v53, %v1443_v52 }
 0x1bb   : > { %v1555_v56 = vadd.f32 %v1547_v26, %v1457_v22 }
 0x1bc   : > { %v1470_v55 = vpop.f32.mrf.mxu2 }
 0x1bd   : > { %v1471_v57 = vadd.f32 %v1470_v55, %v1080_v44  ;;  %v1444_v58 = vpop.f32.mrf.mxu0  ;;  %v1571_v0 = vmul.f32 0.2, %v1555_v56  ;;  %vm1563_vm0 = vcmp.gt.f32.partialorder %v1555_v56, 0.0 }
 0x1be   : > { %v1445_v61 = vadd.f32 %v1444_v58, %v1068_v47 }
 0x1bf   : > { %v1484_v59 = vpop.f32.mrf.mxu3  ;;  %v1579_v5 = vsel %vm1563_vm0, %v1555_v56, %v1571_v0 }
 0x1c0   : > { %v1458_v62 = vpop.f32.mrf.mxu1  ;;  %v1485_v63 = vadd.f32 %v1484_v59, %v1471_v57 }
 0x1c1   : > { %v1459_v2 = vadd.f32 %v1458_v62, %v1445_v61 }
 0x1c2   : > { %v1556_v1 = vadd.f32 %v1548_v60, %v1485_v63 }
 0x1c3   : > { %v1559_v7 = vadd.f32 %v1547_v26, %v1459_v2 }
 0x1c4   : > { %vm1564_vm1 = vcmp.gt.f32.partialorder %v1556_v1, 0.0  ;;  %v1572_v3 = vmul.f32 0.2, %v1556_v1  ;;  %v1472_v4 = vpop.f32.mrf.mxu2 }
 0x1c5   : > { %v1473_v8 = vadd.f32 %v1472_v4, %v1082_v48  ;;  %v1575_v12 = vmul.f32 0.2, %v1559_v7  ;;  %vm1567_vm2 = vcmp.gt.f32.partialorder %v1559_v7, 0.0 }
 0x1c6   : > { %v1580_v6 = vsel %vm1564_vm1, %v1556_v1, %v1572_v3 }
 0x1c7   : > { %v1486_v9 = vpop.f32.mrf.mxu3  ;;  %v1587_v10 = vpack.c.bf16 %v1580_v6, %v1579_v5  ;;  %v1583_v15 = vsel %vm1567_vm2, %v1559_v7, %v1575_v12 }
 0x1c8   : > { %v1487_v11 = vadd.f32 %v1486_v9, %v1473_v8 }
 0x1c9   : > { %1591 = vst [vmem:[#allocation2] sm:$0xff] %v1587_v10 }
 0x1ca   : > { %v1560_v13 = vadd.f32 %v1548_v60, %v1487_v11 }
 0x1cc   : > { %vm1568_vm3 = vcmp.gt.f32.partialorder %v1560_v13, 0.0  ;;  %v1576_v14 = vmul.f32 0.2, %v1560_v13 }
 0x1ce   : > { %v1584_v16 = vsel %vm1568_vm3, %v1560_v13, %v1576_v14 }
 0x1cf   : > { %v1589_v17 = vpack.c.bf16 %v1584_v16, %v1583_v15 }
 0x1d1   : > { %1593 = vst [vmem:[#allocation2 + $0x10] sm:$0xff] %v1589_v17 }
 0x1d5   : > { %v1498_v19 = vpop.f32.mrf.mxu0 }
 0x1d6   : > { %v1499_v20 = vadd.f32 %v1498_v19, %v1094_v45  ;;  %v1512_v21 = vpop.f32.mrf.mxu1 }
 0x1d8   : > { %v1513_v23 = vadd.f32 %v1512_v21, %v1499_v20 }
 0x1da   : > { %v1557_v27 = vadd.f32 %v1549_v24, %v1513_v23 }
 0x1dc   : > { %v1526_v25 = vpop.f32.mrf.mxu2  ;;  %v1573_v35 = vmul.f32 0.2, %v1557_v27  ;;  %vm1565_vm4 = vcmp.gt.f32.partialorder %v1557_v27, 0.0 }
 0x1dd   : > { %v1527_v28 = vadd.f32 %v1526_v25, %v1108_v46  ;;  %v1540_v29 = vpop.f32.mrf.mxu3  ;;  %v1500_v31 = vpop.f32.mrf.mxu0 }
 0x1de   : > { %v1501_v32 = vadd.f32 %v1500_v31, %v1096_v49  ;;  %v1514_v34 = vpop.f32.mrf.mxu1  ;;  %v1581_v40 = vsel %vm1565_vm4, %v1557_v27, %v1573_v35 }
 0x1df   : > { %v1541_v33 = vadd.f32 %v1540_v29, %v1527_v28 }
 0x1e0   : > { %v1515_v37 = vadd.f32 %v1514_v34, %v1501_v32 }
 0x1e1   : > { %v1558_v36 = vadd.f32 %v1550_v30, %v1541_v33 }
 0x1e2   : > { %v1561_v42 = vadd.f32 %v1549_v24, %v1515_v37 }
 0x1e3   : > { %vm1566_vm5 = vcmp.gt.f32.partialorder %v1558_v36, 0.0  ;;  %v1574_v38 = vmul.f32 0.2, %v1558_v36 }
 0x1e4   : > { %v1528_v39 = vpop.f32.mrf.mxu2  ;;  %v1577_v47 = vmul.f32 0.2, %v1561_v42  ;;  %vm1569_vm6 = vcmp.gt.f32.partialorder %v1561_v42, 0.0 }
 0x1e5   : > { %v1582_v41 = vsel %vm1566_vm5, %v1558_v36, %v1574_v38  ;;  %v1529_v43 = vadd.f32 %v1528_v39, %v5376_v50  ;;  %v1542_v45 = vpop.f32.mrf.mxu3 }
 0x1e6   : > { %v1588_v44 = vpack.c.bf16 %v1582_v41, %v1581_v40  ;;  %v1585_v51 = vsel %vm1569_vm6, %v1561_v42, %v1577_v47 }
 0x1e7   : > { %v1543_v46 = vadd.f32 %v1542_v45, %v1529_v43 }
 0x1e8   : > { %1592 = vst [vmem:[#allocation2 + $0x8] sm:$0xff] %v1588_v44 }
 0x1e9   : > { %v1562_v48 = vadd.f32 %v1550_v30, %v1543_v46 }
 0x1eb   : > { %vm1570_vm7 = vcmp.gt.f32.partialorder %v1562_v48, 0.0  ;;  %v1578_v49 = vmul.f32 0.2, %v1562_v48 }
 0x1ed   : > { %v1586_v52 = vsel %vm1570_vm7, %v1562_v48, %v1578_v49 }
 0x1ee   : > { %v1590_v53 = vpack.c.bf16 %v1586_v52, %v1585_v51 }
 0x1f0   : > { %1594 = vst [vmem:[#allocation2 + $0x18] sm:$0xff] %v1590_v53 }
 0x1f1 PF: > { %s5786_s18 = sld [smem:[#allocation40_spill]] }
 0x1f7   : > { %p3410_p5 = scmp.ge.s32.totalorder %s5786_s18, 4 }
 0x1f8   : > { %s5787_s12 = sld [smem:[#allocation40_spill]] (!%p3410_p5) }
 0x1f9   : > { %1606 = sbr.rel (%p3410_p5) target bundleno = 691 (0x2b3), region = 108 }
 0x1fe   : > { %v3996_v50 = vld [vmem:[%s5312_s30 + $0x38] sm:$0xff]  ;;  %v3995_v55 = vld [vmem:[%s5312_s30 + $0x30] sm:$0xff]  ;;  %v3994_v59 = vld [vmem:[%s5312_s30 + $0x28] sm:$0xff]  ;;  %s4021_s10 = sshll.u32 %s5787_s12, 3 }
 0x1ff   : > { %v4004_v54 = vld [vmem:[%s5312_s30 + $0x78] sm:$0xff]  ;;  %1891 = vmatpush.bf16.msra.mxu0 %v3996_v50  ;;  %v4003_v56 = vld [vmem:[%s5312_s30 + $0x70] sm:$0xff]  ;;  %v4002_v60 = vld [vmem:[%s5312_s30 + $0x68] sm:$0xff]  ;;  %s1951_s4 = scalar_lea.vmem [#allocation3], %s4021_s10 }
 0x200   : > { %v4012_v22 = vld [vmem:[%s5312_s30 + $0xb8] sm:$0xff]  ;;  %1905 = vmatpush.bf16.msra.mxu1 %v4004_v54  ;;  %v4011_v57 = vld [vmem:[%s5312_s30 + $0xb0] sm:$0xff]  ;;  %v4010_v61 = vld [vmem:[%s5312_s30 + $0xa8] sm:$0xff] }
 0x201   : > { %v4020_v26 = vld [vmem:[%s5312_s30 + $0xf8] sm:$0xff]  ;;  %1919 = vmatpush.bf16.msra.mxu2 %v4012_v22  ;;  %v4019_v58 = vld [vmem:[%s5312_s30 + $0xf0] sm:$0xff]  ;;  %v4018_v62 = vld [vmem:[%s5312_s30 + $0xe8] sm:$0xff] }
 0x202   : > { %1933 = vmatpush.bf16.msra.mxu3 %v4020_v26  ;;  %v3993_v63 = vld [vmem:[%s5312_s30 + $0x20] sm:$0xff]  ;;  %v3992_v3 = vld [vmem:[%s5312_s30 + $0x18] sm:$0xff]  ;;  %v3991_v7 = vld [vmem:[%s5312_s30 + $0x10] sm:$0xff] }
 0x203   : > { %1892 = vmatpush.bf16.msra.mxu0 %v3995_v55  ;;  %v4001_v0 = vld [vmem:[%s5312_s30 + $0x60] sm:$0xff]  ;;  %v4000_v4 = vld [vmem:[%s5312_s30 + $0x58] sm:$0xff]  ;;  %v3999_v8 = vld [vmem:[%s5312_s30 + $0x50] sm:$0xff] }
 0x204   : > { %1906 = vmatpush.bf16.msra.mxu1 %v4003_v56  ;;  %v4009_v1 = vld [vmem:[%s5312_s30 + $0xa0] sm:$0xff]  ;;  %v4008_v5 = vld [vmem:[%s5312_s30 + $0x98] sm:$0xff]  ;;  %v4007_v9 = vld [vmem:[%s5312_s30 + $0x90] sm:$0xff] }
 0x205   : > { %1920 = vmatpush.bf16.msra.mxu2 %v4011_v57  ;;  %v4017_v2 = vld [vmem:[%s5312_s30 + $0xe0] sm:$0xff]  ;;  %v4016_v6 = vld [vmem:[%s5312_s30 + $0xd8] sm:$0xff]  ;;  %v4015_v10 = vld [vmem:[%s5312_s30 + $0xd0] sm:$0xff] }
 0x206   : > { %1934 = vmatpush.bf16.msra.mxu3 %v4019_v58  ;;  %v3990_v11 = vld [vmem:[%s5312_s30 + $0x8] sm:$0xff]  ;;  %v3989_v15 = vld [vmem:[%s5312_s30] sm:$0xff]  ;;  %v3987_v20 = vld [vmem:[#allocation2 + $0xc] sm:$0xf0] }
 0x207   : > { %1893 = vmatpush.bf16.msra.mxu0 %v3994_v59  ;;  %v3998_v12 = vld [vmem:[%s5312_s30 + $0x48] sm:$0xff]  ;;  %v3997_v16 = vld [vmem:[%s5312_s30 + $0x40] sm:$0xff]  ;;  %v3415_v23 = vld [vmem:[#allocation2 + $0x10] sm:$0xf0] }
 0x208   : > { %1907 = vmatpush.bf16.msra.mxu1 %v4002_v60  ;;  %v4006_v13 = vld [vmem:[%s5312_s30 + $0x88] sm:$0xff]  ;;  %v4005_v17 = vld [vmem:[%s5312_s30 + $0x80] sm:$0xff]  ;;  %v3988_v25 = vld [vmem:[#allocation2 + $0x14] sm:$0xf0] }
 0x209   : > { %1921 = vmatpush.bf16.msra.mxu2 %v4010_v61  ;;  %v4014_v14 = vld [vmem:[%s5312_s30 + $0xc8] sm:$0xff]  ;;  %v4013_v18 = vld [vmem:[%s5312_s30 + $0xc0] sm:$0xff]  ;;  %v3423_v28 = vld [vmem:[#allocation2 + $0x18] sm:$0xf0] }
 0x20a   : > { %1935 = vmatpush.bf16.msra.mxu3 %v4018_v62  ;;  %v3413_v19 = vld [vmem:[#allocation2] sm:$0xf]  ;;  %v3985_v21 = vld [vmem:[#allocation2 + $0x4] sm:$0xf]  ;;  %v3421_v24 = vld [vmem:[#allocation2 + $0x8] sm:$0xf] }
 0x20b   : > { %1894 = vmatpush.bf16.msra.mxu0 %v3993_v63  ;;  %v3986_v27 = vld [vmem:[#allocation2 + $0xc] sm:$0xf]  ;;  %v3414_v29 = vor.u32 %v3987_v20, %v3413_v19  ;;  %v3418_v30 = vor.u32 %v3985_v21, %v3415_v23  ;;  %v3422_v31 = vor.u32 %v3988_v25, %v3421_v24  ;;  %v4336_v34 = vld [vmem:[%s5336_s2] ss:$0 sm:$0xff] }
 0x20c   : > { %1908 = vmatpush.bf16.msra.mxu1 %v4001_v0  ;;  %v3426_v32 = vor.u32 %v3986_v27, %v3423_v28 }
 0x20d   : > { %1922 = vmatpush.bf16.msra.mxu2 %v4009_v1 }
 0x20e   : > { %1936 = vmatpush.bf16.msra.mxu3 %v4017_v2 }
 0x20f   : > { %1895 = vmatpush.bf16.msra.mxu0 %v3992_v3 }
 0x210   : > { %1909 = vmatpush.bf16.msra.mxu1 %v4000_v4 }
 0x211   : > { %1923 = vmatpush.bf16.msra.mxu2 %v4008_v5 }
 0x212   : > { %1937 = vmatpush.bf16.msra.mxu3 %v4016_v6 }
 0x213   : > { %1896 = vmatpush.bf16.msra.mxu0 %v3991_v7 }
 0x214   : > { %1910 = vmatpush.bf16.msra.mxu1 %v3999_v8 }
 0x215   : > { %1924 = vmatpush.bf16.msra.mxu2 %v4007_v9 }
 0x216   : > { %1938 = vmatpush.bf16.msra.mxu3 %v4015_v10 }
 0x217   : > { %1897 = vmatpush.bf16.msra.mxu0 %v3990_v11 }
 0x218   : > { %1911 = vmatpush.bf16.msra.mxu1 %v3998_v12 }
 0x219   : > { %1925 = vmatpush.bf16.msra.mxu2 %v4006_v13 }
 0x21a   : > { %1939 = vmatpush.bf16.msra.mxu3 %v4014_v14 }
 0x21b   : > { %1898 = vmatpush.bf16.msra.mxu0 %v3989_v15 }
 0x21c   : > { %1912 = vmatpush.bf16.msra.mxu1 %v3997_v16 }
 0x21d   : > { %1926 = vmatpush.bf16.msra.mxu2 %v4005_v17 }
 0x21e   : > { %1940 = vmatpush.bf16.msra.mxu3 %v4013_v18  ;;  %1899 = vmatmul.bf16.vlgmr.msra.gmra.mxu0 %v3414_v29 }
 0x21f   : > { %1913 = vmatmul.bf16.vlgmr.msra.gmra.mxu1 %v3418_v30 }
 0x220   : > { %1927 = vmatmul.bf16.vlgmr.msra.gmra.mxu2 %v3422_v31 }
 0x221   : > { %1941 = vmatmul.bf16.vlgmr.msra.gmra.mxu3 %v3426_v32 }
 0x29b   : > { %v1900_v33 = vpop.f32.mrf.mxu0 }
 0x29c   : > { %v1914_v35 = vpop.f32.mrf.mxu1  ;;  %v1901_v36 = vadd.f32 %v4336_v34, %v1900_v33 }
 0x29e   : > { %v1915_v40 = vadd.f32 %v1914_v35, %v1901_v36 }
 0x2a3   : > { %v1928_v37 = vpop.f32.mrf.mxu2  ;;  %v1902_v39 = vpop.f32.mrf.mxu0 }
 0x2a4   : > { %v1942_v38 = vpop.f32.mrf.mxu3  ;;  %v1903_v41 = vadd.f32 %v4336_v34, %v1902_v39  ;;  %v1916_v42 = vpop.f32.mrf.mxu1  ;;  %v1929_v43 = vadd.f32 %v1928_v37, %v1915_v40 }
 0x2a6   : > { %v1917_v44 = vadd.f32 %v1916_v42, %v1903_v41  ;;  %v1943_v48 = vadd.f32 %v1942_v38, %v1929_v43 }
 0x2ab   : > { %v1930_v45 = vpop.f32.mrf.mxu2 }
 0x2ac   : > { %v1931_v46 = vadd.f32 %v1930_v45, %v1917_v44  ;;  %v1944_v47 = vpop.f32.mrf.mxu3 }
 0x2ae   : > { %v1945_v49 = vadd.f32 %v1944_v47, %v1931_v46 }
 0x2b0   : > { %v4097_v51 = vpack.c.bf16 %v1945_v49, %v1943_v48 }
 0x2b2   : > { %4098 = vst [vmem:[%s1951_s4] sm:$0xff] %v4097_v51  }
 0x2b3 PF: > { %s5788_s6 = sld [smem:[#allocation40_spill]] }
 0x2b9   : > { %p1955_p4 = scmp.lt.s32.totalorder %s5788_s6, 8 }
 0x2bb   : > { %p1956_p10 = pnand %p3410_p5, %p1955_p4 }
 0x2bc   : > { %s5789_s22 = sld [smem:[#allocation40_spill]] (!%p1956_p10) }
 0x2bd   : > { %1959 = sbr.rel (%p1956_p10) target bundleno = 885 (0x375), region = 112 }
 0x2c2   : > { %v3678_v52 = vld [vmem:[%s5321_s20 + $0xe0] sm:$0xf]  ;;  %v4054_v53 = vld [vmem:[%s5321_s20 + $0xec] sm:$0xf0]  ;;  %v4052_v50 = vld [vmem:[%s5321_s20 + $0xe4] sm:$0xf] }
 0x2c3   : > { %v3679_v54 = vor.u32 %v4054_v53, %v3678_v52  ;;  %v3680_v22 = vld [vmem:[%s5321_s20 + $0xf0] sm:$0xf0]  ;;  %v3686_v26 = vld [vmem:[%s5321_s20 + $0xe8] sm:$0xf]  ;;  %v4055_v55 = vld [vmem:[%s5321_s20 + $0xf4] sm:$0xf0] }
 0x2c4   : > { %v3683_v56 = vor.u32 %v4052_v50, %v3680_v22  ;;  %v3687_v57 = vor.u32 %v4055_v55, %v3686_v26  ;;  %v4053_v58 = vld [vmem:[%s5321_s20 + $0xec] sm:$0xf]  ;;  %v3688_v59 = vld [vmem:[%s5321_s20 + $0xf8] sm:$0xf0]  ;;  %v3662_v60 = vld [vmem:[%s5321_s20 + $0xc0] sm:$0xf] }
 0x2c5   : > { %2172 = vmatpush.bf16.msra.mxu0 %v3679_v54  ;;  %v3691_v61 = vor.u32 %v4053_v58, %v3688_v59  ;;  %v4050_v62 = vld [vmem:[%s5321_s20 + $0xcc] sm:$0xf0]  ;;  %v4048_v63 = vld [vmem:[%s5321_s20 + $0xc4] sm:$0xf]  ;;  %v3664_v0 = vld [vmem:[%s5321_s20 + $0xd0] sm:$0xf0] }
 0x2c6   : > { %2186 = vmatpush.bf16.msra.mxu1 %v3683_v56  ;;  %2200 = vmatpush.bf16.msra.mxu2 %v3687_v57  ;;  %v3663_v1 = vor.u32 %v4050_v62, %v3662_v60  ;;  %v3667_v2 = vor.u32 %v4048_v63, %v3664_v0  ;;  %v3670_v3 = vld [vmem:[%s5321_s20 + $0xc8] sm:$0xf]  ;;  %v4051_v4 = vld [vmem:[%s5321_s20 + $0xd4] sm:$0xf0]  ;;  %v4049_v5 = vld [vmem:[%s5321_s20 + $0xcc] sm:$0xf] }
 0x2c7   : > { %2214 = vmatpush.bf16.msra.mxu3 %v3691_v61  ;;  %v3671_v6 = vor.u32 %v4051_v4, %v3670_v3  ;;  %v3672_v7 = vld [vmem:[%s5321_s20 + $0xd8] sm:$0xf0]  ;;  %v3646_v8 = vld [vmem:[%s5321_s20 + $0xa0] sm:$0xf]  ;;  %v4046_v9 = vld [vmem:[%s5321_s20 + $0xac] sm:$0xf0] }
 0x2c8   : > { %v3675_v10 = vor.u32 %v4049_v5, %v3672_v7  ;;  %v4044_v11 = vld [vmem:[%s5321_s20 + $0xa4] sm:$0xf]  ;;  %v3648_v12 = vld [vmem:[%s5321_s20 + $0xb0] sm:$0xf0]  ;;  %v3654_v13 = vld [vmem:[%s5321_s20 + $0xa8] sm:$0xf]  ;;  %v3647_v14 = vor.u32 %v4046_v9, %v3646_v8 }
 0x2c9   : > { %2173 = vmatpush.bf16.msra.mxu0 %v3663_v1  ;;  %v4047_v15 = vld [vmem:[%s5321_s20 + $0xb4] sm:$0xf0]  ;;  %v4045_v16 = vld [vmem:[%s5321_s20 + $0xac] sm:$0xf]  ;;  %v3656_v17 = vld [vmem:[%s5321_s20 + $0xb8] sm:$0xf0]  ;;  %v3651_v18 = vor.u32 %v4044_v11, %v3648_v12 }
 0x2ca   : > { %2187 = vmatpush.bf16.msra.mxu1 %v3667_v2  ;;  %2201 = vmatpush.bf16.msra.mxu2 %v3671_v6  ;;  %v3655_v19 = vor.u32 %v4047_v15, %v3654_v13  ;;  %v3630_v20 = vld [vmem:[%s5321_s20 + $0x80] sm:$0xf]  ;;  %v4042_v21 = vld [vmem:[%s5321_s20 + $0x8c] sm:$0xf0]  ;;  %v4040_v23 = vld [vmem:[%s5321_s20 + $0x84] sm:$0xf]  ;;  %v3659_v24 = vor.u32 %v4045_v16, %v3656_v17 }
 0x2cb   : > { %2215 = vmatpush.bf16.msra.mxu3 %v3675_v10  ;;  %v3632_v25 = vld [vmem:[%s5321_s20 + $0x90] sm:$0xf0]  ;;  %v3638_v27 = vld [vmem:[%s5321_s20 + $0x88] sm:$0xf]  ;;  %v4043_v28 = vld [vmem:[%s5321_s20 + $0x94] sm:$0xf0]  ;;  %v3631_v31 = vor.u32 %v4042_v21, %v3630_v20 }
 0x2cc   : > { %v4041_v29 = vld [vmem:[%s5321_s20 + $0x8c] sm:$0xf]  ;;  %v3640_v30 = vld [vmem:[%s5321_s20 + $0x98] sm:$0xf0]  ;;  %v3635_v32 = vor.u32 %v4040_v23, %v3632_v25  ;;  %v3639_v33 = vor.u32 %v4043_v28, %v3638_v27  ;;  %v3614_v34 = vld [vmem:[%s5321_s20 + $0x60] sm:$0xf] }
 0x2cd   : > { %2174 = vmatpush.bf16.msra.mxu0 %v3647_v14  ;;  %v4038_v35 = vld [vmem:[%s5321_s20 + $0x6c] sm:$0xf0]  ;;  %v4036_v36 = vld [vmem:[%s5321_s20 + $0x64] sm:$0xf]  ;;  %v3643_v37 = vor.u32 %v4041_v29, %v3640_v30  ;;  %v3616_v38 = vld [vmem:[%s5321_s20 + $0x70] sm:$0xf0] }
 0x2ce   : > { %2188 = vmatpush.bf16.msra.mxu1 %v3651_v18  ;;  %2202 = vmatpush.bf16.msra.mxu2 %v3655_v19  ;;  %v3622_v39 = vld [vmem:[%s5321_s20 + $0x68] sm:$0xf]  ;;  %v4039_v40 = vld [vmem:[%s5321_s20 + $0x74] sm:$0xf0]  ;;  %v4037_v41 = vld [vmem:[%s5321_s20 + $0x6c] sm:$0xf]  ;;  %v3615_v43 = vor.u32 %v4038_v35, %v3614_v34  ;;  %v3619_v44 = vor.u32 %v4036_v36, %v3616_v38 }
 0x2cf   : > { %2216 = vmatpush.bf16.msra.mxu3 %v3659_v24  ;;  %v3624_v42 = vld [vmem:[%s5321_s20 + $0x78] sm:$0xf0]  ;;  %v3623_v45 = vor.u32 %v4039_v40, %v3622_v39  ;;  %v3598_v46 = vld [vmem:[%s5321_s20 + $0x40] sm:$0xf]  ;;  %v4034_v47 = vld [vmem:[%s5321_s20 + $0x4c] sm:$0xf0] }
 0x2d0   : > { %v4032_v48 = vld [vmem:[%s5321_s20 + $0x44] sm:$0xf]  ;;  %v3627_v49 = vor.u32 %v4037_v41, %v3624_v42  ;;  %v3600_v51 = vld [vmem:[%s5321_s20 + $0x50] sm:$0xf0]  ;;  %v3606_v52 = vld [vmem:[%s5321_s20 + $0x48] sm:$0xf]  ;;  %v3599_v22 = vor.u32 %v4034_v47, %v3598_v46 }
 0x2d1   : > { %2175 = vmatpush.bf16.msra.mxu0 %v3631_v31  ;;  %v4035_v53 = vld [vmem:[%s5321_s20 + $0x54] sm:$0xf0]  ;;  %v4033_v50 = vld [vmem:[%s5321_s20 + $0x4c] sm:$0xf]  ;;  %v3608_v54 = vld [vmem:[%s5321_s20 + $0x58] sm:$0xf0]  ;;  %v3603_v55 = vor.u32 %v4032_v48, %v3600_v51 }
 0x2d2   : > { %2189 = vmatpush.bf16.msra.mxu1 %v3635_v32  ;;  %2203 = vmatpush.bf16.msra.mxu2 %v3639_v33  ;;  %v3582_v26 = vld [vmem:[%s5321_s20 + $0x20] sm:$0xf]  ;;  %v3607_v56 = vor.u32 %v4035_v53, %v3606_v52  ;;  %v4030_v57 = vld [vmem:[%s5321_s20 + $0x2c] sm:$0xf0]  ;;  %v4028_v58 = vld [vmem:[%s5321_s20 + $0x24] sm:$0xf]  ;;  %v3611_v60 = vor.u32 %v4033_v50, %v3608_v54 }
 0x2d3   : > { %2217 = vmatpush.bf16.msra.mxu3 %v3643_v37  ;;  %v3584_v59 = vld [vmem:[%s5321_s20 + $0x30] sm:$0xf0]  ;;  %v3590_v61 = vld [vmem:[%s5321_s20 + $0x28] sm:$0xf]  ;;  %v4031_v62 = vld [vmem:[%s5321_s20 + $0x34] sm:$0xf0]  ;;  %v3583_v1 = vor.u32 %v4030_v57, %v3582_v26 }
 0x2d4   : > { %s3557_s23 = sadd.s32 4294967292, %s5789_s22  ;;  %v4029_v63 = vld [vmem:[%s5321_s20 + $0x2c] sm:$0xf]  ;;  %v3592_v0 = vld [vmem:[%s5321_s20 + $0x38] sm:$0xf0]  ;;  %v3587_v3 = vor.u32 %v4028_v58, %v3584_v59  ;;  %v3591_v4 = vor.u32 %v4031_v62, %v3590_v61  ;;  %v1961_v18 = vld [vmem:[#allocation4 + $0x30] sm:$0xff] }
 0x2d5   : > { %2176 = vmatpush.bf16.msra.mxu0 %v3615_v43  ;;  %v3566_v2 = vld [vmem:[%s5321_s20] sm:$0xf]  ;;  %v4026_v5 = vld [vmem:[%s5321_s20 + $0xc] sm:$0xf0]  ;;  %v4024_v6 = vld [vmem:[%s5321_s20 + $0x4] sm:$0xf]  ;;  %v3595_v7 = vor.u32 %v4029_v63, %v3592_v0 }
 0x2d6   : > { %2190 = vmatpush.bf16.msra.mxu1 %v3619_v44  ;;  %2204 = vmatpush.bf16.msra.mxu2 %v3623_v45  ;;  %s4022_s5 = sshll.u32 %s3557_s23, 3  ;;  %v3568_v8 = vld [vmem:[%s5321_s20 + $0x10] sm:$0xf0]  ;;  %v3574_v9 = vld [vmem:[%s5321_s20 + $0x8] sm:$0xf]  ;;  %v3567_v13 = vor.u32 %v4026_v5, %v3566_v2  ;;  %v1962_v19 = vld [vmem:[#allocation4] sm:$0xff] }
 0x2d7   : > { %2218 = vmatpush.bf16.msra.mxu3 %v3627_v49  ;;  %v4027_v10 = vld [vmem:[%s5321_s20 + $0x14] sm:$0xf0]  ;;  %v4025_v11 = vld [vmem:[%s5321_s20 + $0xc] sm:$0xf]  ;;  %v3576_v12 = vld [vmem:[%s5321_s20 + $0x18] sm:$0xf0]  ;;  %v3571_v14 = vor.u32 %v4024_v6, %v3568_v8 }
 0x2d8   : > { %v3575_v15 = vor.u32 %v4027_v10, %v3574_v9  ;;  %v3579_v16 = vor.u32 %v4025_v11, %v3576_v12  ;;  %s1971_s30 = scalar_lea.vmem [#allocation3], %s4022_s5  ;;  %v1963_v25 = vld [vmem:[#allocation4 + $0x18] sm:$0xff]  ;;  %v1964_v27 = vld [vmem:[#allocation4 + $0x10] sm:$0xff]  ;;  %v1965_v28 = vld [vmem:[#allocation4 + $0x8] sm:$0xff] }
 0x2d9   : > { %2177 = vmatpush.bf16.msra.mxu0 %v3599_v22  ;;  %v4023_v17 = vld [vmem:[%s1971_s30] sm:$0xff]  ;;  %v1967_v38 = vld [vmem:[#allocation4 + $0x28] sm:$0xff]  ;;  %v1968_v39 = vld [vmem:[#allocation4 + $0x38] sm:$0xff] }
 0x2da   : > { %2191 = vmatpush.bf16.msra.mxu1 %v3603_v55  ;;  %2205 = vmatpush.bf16.msra.mxu2 %v3607_v56  ;;  %v1966_v30 = vld [vmem:[#allocation4 + $0x20] sm:$0xff] }
 0x2db   : > { %2219 = vmatpush.bf16.msra.mxu3 %v3611_v60 }
 0x2dd   : > { %2178 = vmatpush.bf16.msra.mxu0 %v3583_v1 }
 0x2de   : > { %2192 = vmatpush.bf16.msra.mxu1 %v3587_v3  ;;  %2206 = vmatpush.bf16.msra.mxu2 %v3591_v4 }
 0x2df   : > { %2220 = vmatpush.bf16.msra.mxu3 %v3595_v7 }
 0x2e1   : > { %2179 = vmatpush.bf16.msra.mxu0 %v3567_v13 }
 0x2e2   : > { %2193 = vmatpush.bf16.msra.mxu1 %v3571_v14  ;;  %2207 = vmatpush.bf16.msra.mxu2 %v3575_v15 }
 0x2e3   : > { %2221 = vmatpush.bf16.msra.mxu3 %v3579_v16 }
 0x2e4   : > { %2180 = vmatmul.bf16.vlgmr.msra.gmra.mxu0 %v4023_v17 }
 0x2e5   : > { %2194 = vmatmul.bf16.vlgmr.msra.gmra.mxu1 %v4023_v17  ;;  %2208 = vmatmul.bf16.vlgmr.msra.gmra.mxu2 %v4023_v17 }
 0x2e6   : > { %2222 = vmatmul.bf16.vlgmr.msra.gmra.mxu3 %v4023_v17 }
 0x361   : > { %v2181_v20 = vpop.f32.mrf.mxu0 }
 0x362   : > { %v2228_v21 = vadd.f32 %v2181_v20, %v1961_v18  ;;  %v2195_v23 = vpop.f32.mrf.mxu1 }
 0x363   : > { %v2229_v24 = vadd.f32 %v2195_v23, %v1962_v19 }
 0x364   : > { %2236 = vst [vmem:[#allocation4 + $0x30] sm:$0xff] %v2228_v21 }
 0x365   : > { %2237 = vst [vmem:[#allocation4] sm:$0xff] %v2229_v24 }
 0x368   : > { %v2209_v29 = vpop.f32.mrf.mxu2 }
 0x369   : > { %v2230_v31 = vadd.f32 %v2209_v29, %v1963_v25  ;;  %v2223_v32 = vpop.f32.mrf.mxu3  ;;  %v2183_v33 = vpop.f32.mrf.mxu0 }
 0x36a   : > { %v2231_v34 = vadd.f32 %v2223_v32, %v1964_v27  ;;  %v2232_v35 = vadd.f32 %v2183_v33, %v1965_v28  ;;  %v2197_v36 = vpop.f32.mrf.mxu1 }
 0x36b   : > { %2238 = vst [vmem:[#allocation4 + $0x18] sm:$0xff] %v2230_v31  ;;  %v2233_v37 = vadd.f32 %v2197_v36, %v1966_v30 }
 0x36c   : > { %2239 = vst [vmem:[#allocation4 + $0x10] sm:$0xff] %v2231_v34 }
 0x36d   : > { %2240 = vst [vmem:[#allocation4 + $0x8] sm:$0xff] %v2232_v35 }
 0x36e   : > { %2241 = vst [vmem:[#allocation4 + $0x20] sm:$0xff] %v2233_v37 }
 0x370   : > { %v2211_v40 = vpop.f32.mrf.mxu2 }
 0x371   : > { %v2234_v41 = vadd.f32 %v2211_v40, %v1967_v38  ;;  %v2225_v42 = vpop.f32.mrf.mxu3 }
 0x372   : > { %v2235_v43 = vadd.f32 %v2225_v42, %v1968_v39 }
 0x373   : > { %2242 = vst [vmem:[#allocation4 + $0x28] sm:$0xff] %v2234_v41 }
 0x374   : > { %2243 = vst [vmem:[#allocation4 + $0x38] sm:$0xff] %v2235_v43 }
 0x375 PF: > { %s5790_s0 = sld [smem:[#allocation40_spill]] }
 0x37b   : > { %p3692_p12 = scmp.ne.s32.totalorder %s5790_s0, 7 }
 0x37c   : > { %s5791_s11 = sld [smem:[#allocation69_spill]] (!%p3692_p12) }
 0x37d   : > { %2247 = sbr.rel (%p3692_p12) target bundleno = 915 (0x393), region = 116 }
 0x382   : > { %v2248_v44 = vld [vmem:[#allocation4 + $0x30] sm:$0xff]  ;;  %v2249_v45 = vld [vmem:[#allocation4] sm:$0xff]  ;;  %v2250_v49 = vld [vmem:[#allocation4 + $0x18] sm:$0xff] }
 0x383   : > { %v2256_v46 = vld [vmem:[%s5791_s11] sm:$0xf]  ;;  %v2251_v51 = vld [vmem:[#allocation4 + $0x10] sm:$0xff]  ;;  %v2252_v50 = vld [vmem:[#allocation4 + $0x8] sm:$0xff] }
 0x384   : > { %v2258_v47 = vperm.slane %v2256_v46, 0  ;;  %v2259_v48 = vperm.slane %v2256_v46, 1  ;;  %v2260_v52 = vperm.slane %v2256_v46, 2  ;;  %v2261_v53 = vperm.slane %v2256_v46, 3  ;;  %v2253_v54 = vld [vmem:[#allocation4 + $0x20] sm:$0xff]  ;;  %v2254_v22 = vld [vmem:[#allocation4 + $0x28] sm:$0xff] }
 0x385   : > { %v2255_v58 = vld [vmem:[#allocation4 + $0x38] sm:$0xff] }
 0x386   : > { %v2266_v26 = vadd.f32 %v2258_v47, %v2248_v44  ;;  %v2267_v55 = vadd.f32 %v2259_v48, %v2249_v45  ;;  %v2268_v56 = vadd.f32 %v2260_v52, %v2250_v49  ;;  %v2269_v57 = vadd.f32 %v2261_v53, %v2251_v51 }
 0x387   : > { %v2270_v59 = vadd.f32 %v2258_v47, %v2252_v50  ;;  %v2271_v60 = vadd.f32 %v2259_v48, %v2253_v54  ;;  %v2272_v61 = vadd.f32 %v2260_v52, %v2254_v22  ;;  %v2273_v62 = vadd.f32 %v2261_v53, %v2255_v58 }
 0x388   : > { %vm2274_vm8 = vcmp.gt.f32.partialorder %v2266_v26, 0.0  ;;  %vm2275_vm9 = vcmp.gt.f32.partialorder %v2267_v55, 0.0  ;;  %v2282_v63 = vmul.f32 0.2, %v2266_v26  ;;  %v2283_v0 = vmul.f32 0.2, %v2267_v55 }
 0x389   : > { %vm2276_vm10 = vcmp.gt.f32.partialorder %v2268_v56, 0.0  ;;  %vm2277_vm11 = vcmp.gt.f32.partialorder %v2269_v57, 0.0  ;;  %v2284_v1 = vmul.f32 0.2, %v2268_v56  ;;  %v2285_v2 = vmul.f32 0.2, %v2269_v57 }
 0x38a   : > { %v2290_v3 = vsel %vm2274_vm8, %v2266_v26, %v2282_v63  ;;  %v2291_v4 = vsel %vm2275_vm9, %v2267_v55, %v2283_v0  ;;  %vm2278_vm12 = vcmp.gt.f32.partialorder %v2270_v59, 0.0  ;;  %vm2279_vm13 = vcmp.gt.f32.partialorder %v2271_v60, 0.0 }
 0x38b   : > { %v2298_v5 = vpack.c.bf16 %v2291_v4, %v2290_v3  ;;  %v2292_v6 = vsel %vm2276_vm10, %v2268_v56, %v2284_v1  ;;  %v2293_v7 = vsel %vm2277_vm11, %v2269_v57, %v2285_v2  ;;  %v2286_v8 = vmul.f32 0.2, %v2270_v59 }
 0x38c   : > { %v2299_v9 = vpack.c.bf16 %v2293_v7, %v2292_v6  ;;  %v2287_v10 = vmul.f32 0.2, %v2271_v60  ;;  %vm2280_vm14 = vcmp.gt.f32.partialorder %v2272_v61, 0.0  ;;  %vm2281_vm15 = vcmp.gt.f32.partialorder %v2273_v62, 0.0 }
 0x38d   : > { %2302 = vst [vmem:[#allocation5] sm:$0xff] %v2298_v5  ;;  %v2294_v11 = vsel %vm2278_vm12, %v2270_v59, %v2286_v8  ;;  %v2288_v12 = vmul.f32 0.2, %v2272_v61  ;;  %v2289_v13 = vmul.f32 0.2, %v2273_v62 }
 0x38e   : > { %2303 = vst [vmem:[#allocation5 + $0x8] sm:$0xff] %v2299_v9  ;;  %v2295_v14 = vsel %vm2279_vm13, %v2271_v60, %v2287_v10 }
 0x38f   : > { %v2300_v15 = vpack.c.bf16 %v2295_v14, %v2294_v11  ;;  %v2296_v16 = vsel %vm2280_vm14, %v2272_v61, %v2288_v12  ;;  %v2297_v17 = vsel %vm2281_vm15, %v2273_v62, %v2289_v13 }
 0x390   : > { %v2301_v18 = vpack.c.bf16 %v2297_v17, %v2296_v16 }
 0x391   : > { %2304 = vst [vmem:[#allocation5 + $0x10] sm:$0xff] %v2300_v15 }
 0x392   : > { %2305 = vst [vmem:[#allocation5 + $0x18] sm:$0xff] %v2301_v18 }
 0x393 PF: > { %2309 = sbr.rel (%p1955_p4) target bundleno = 1099 (0x44b), region = 120 }
 0x398   : > { %v4067_v19 = vld [vmem:[%s5328_s3 + $0x38] sm:$0xff]  ;;  %v4066_v24 = vld [vmem:[%s5328_s3 + $0x30] sm:$0xff]  ;;  %v4065_v29 = vld [vmem:[%s5328_s3 + $0x28] sm:$0xff] }
 0x399   : > { %v4075_v20 = vld [vmem:[%s5328_s3 + $0x78] sm:$0xff]  ;;  %2594 = vmatpush.bf16.msra.mxu0 %v4067_v19  ;;  %v4074_v25 = vld [vmem:[%s5328_s3 + $0x70] sm:$0xff]  ;;  %v4073_v30 = vld [vmem:[%s5328_s3 + $0x68] sm:$0xff] }
 0x39a   : > { %v4083_v21 = vld [vmem:[%s5328_s3 + $0xb8] sm:$0xff]  ;;  %2608 = vmatpush.bf16.msra.mxu1 %v4075_v20  ;;  %v4082_v27 = vld [vmem:[%s5328_s3 + $0xb0] sm:$0xff]  ;;  %v4081_v31 = vld [vmem:[%s5328_s3 + $0xa8] sm:$0xff] }
 0x39b   : > { %v4091_v23 = vld [vmem:[%s5328_s3 + $0xf8] sm:$0xff]  ;;  %2622 = vmatpush.bf16.msra.mxu2 %v4083_v21  ;;  %v4090_v28 = vld [vmem:[%s5328_s3 + $0xf0] sm:$0xff]  ;;  %v4089_v32 = vld [vmem:[%s5328_s3 + $0xe8] sm:$0xff] }
 0x39c   : > { %2636 = vmatpush.bf16.msra.mxu3 %v4091_v23  ;;  %v4064_v33 = vld [vmem:[%s5328_s3 + $0x20] sm:$0xff]  ;;  %v4063_v37 = vld [vmem:[%s5328_s3 + $0x18] sm:$0xff]  ;;  %v4062_v41 = vld [vmem:[%s5328_s3 + $0x10] sm:$0xff] }
 0x39d   : > { %2595 = vmatpush.bf16.msra.mxu0 %v4066_v24  ;;  %v4072_v34 = vld [vmem:[%s5328_s3 + $0x60] sm:$0xff]  ;;  %v4071_v38 = vld [vmem:[%s5328_s3 + $0x58] sm:$0xff]  ;;  %v4070_v42 = vld [vmem:[%s5328_s3 + $0x50] sm:$0xff] }
 0x39e   : > { %2609 = vmatpush.bf16.msra.mxu1 %v4074_v25  ;;  %v4080_v35 = vld [vmem:[%s5328_s3 + $0xa0] sm:$0xff]  ;;  %v4079_v39 = vld [vmem:[%s5328_s3 + $0x98] sm:$0xff]  ;;  %v4078_v43 = vld [vmem:[%s5328_s3 + $0x90] sm:$0xff] }
 0x39f   : > { %2623 = vmatpush.bf16.msra.mxu2 %v4082_v27  ;;  %v4088_v36 = vld [vmem:[%s5328_s3 + $0xe0] sm:$0xff]  ;;  %v4087_v40 = vld [vmem:[%s5328_s3 + $0xd8] sm:$0xff]  ;;  %v4086_v44 = vld [vmem:[%s5328_s3 + $0xd0] sm:$0xff] }
 0x3a0   : > { %2637 = vmatpush.bf16.msra.mxu3 %v4090_v28  ;;  %v4061_v45 = vld [vmem:[%s5328_s3 + $0x8] sm:$0xff]  ;;  %v4060_v49 = vld [vmem:[%s5328_s3] sm:$0xff]  ;;  %v4058_v54 = vld [vmem:[#allocation5 + $0xc] sm:$0xf0] }
 0x3a1   : > { %2596 = vmatpush.bf16.msra.mxu0 %v4065_v29  ;;  %v4069_v46 = vld [vmem:[%s5328_s3 + $0x48] sm:$0xff]  ;;  %v4068_v51 = vld [vmem:[%s5328_s3 + $0x40] sm:$0xff]  ;;  %v3698_v26 = vld [vmem:[#allocation5 + $0x10] sm:$0xf0] }
 0x3a2   : > { %2610 = vmatpush.bf16.msra.mxu1 %v4073_v30  ;;  %v4077_v47 = vld [vmem:[%s5328_s3 + $0x88] sm:$0xff]  ;;  %v4076_v52 = vld [vmem:[%s5328_s3 + $0x80] sm:$0xff]  ;;  %v4059_v56 = vld [vmem:[#allocation5 + $0x14] sm:$0xf0] }
 0x3a3   : > { %2624 = vmatpush.bf16.msra.mxu2 %v4081_v31  ;;  %v4085_v48 = vld [vmem:[%s5328_s3 + $0xc8] sm:$0xff]  ;;  %v4084_v53 = vld [vmem:[%s5328_s3 + $0xc0] sm:$0xff]  ;;  %v3706_v58 = vld [vmem:[#allocation5 + $0x18] sm:$0xf0] }
 0x3a4   : > { %2638 = vmatpush.bf16.msra.mxu3 %v4089_v32  ;;  %v3696_v50 = vld [vmem:[#allocation5] sm:$0xf]  ;;  %v4056_v22 = vld [vmem:[#allocation5 + $0x4] sm:$0xf]  ;;  %v3704_v55 = vld [vmem:[#allocation5 + $0x8] sm:$0xf] }
 0x3a5   : > { %2597 = vmatpush.bf16.msra.mxu0 %v4064_v33  ;;  %v4057_v57 = vld [vmem:[#allocation5 + $0xc] sm:$0xf]  ;;  %v3697_v59 = vor.u32 %v4058_v54, %v3696_v50  ;;  %v3701_v60 = vor.u32 %v4056_v22, %v3698_v26  ;;  %v3705_v61 = vor.u32 %v4059_v56, %v3704_v55  ;;  %v4337_v63 = vld [vmem:[%s5342_s15] ss:$0 sm:$0xff] }
 0x3a6   : > { %2611 = vmatpush.bf16.msra.mxu1 %v4072_v34  ;;  %v3709_v62 = vor.u32 %v4057_v57, %v3706_v58 }
 0x3a7   : > { %2625 = vmatpush.bf16.msra.mxu2 %v4080_v35 }
 0x3a8   : > { %2639 = vmatpush.bf16.msra.mxu3 %v4088_v36 }
 0x3a9   : > { %2598 = vmatpush.bf16.msra.mxu0 %v4063_v37 }
 0x3aa   : > { %2612 = vmatpush.bf16.msra.mxu1 %v4071_v38 }
 0x3ab   : > { %2626 = vmatpush.bf16.msra.mxu2 %v4079_v39 }
 0x3ac   : > { %2640 = vmatpush.bf16.msra.mxu3 %v4087_v40 }
 0x3ad   : > { %2599 = vmatpush.bf16.msra.mxu0 %v4062_v41 }
 0x3ae   : > { %2613 = vmatpush.bf16.msra.mxu1 %v4070_v42 }
 0x3af   : > { %2627 = vmatpush.bf16.msra.mxu2 %v4078_v43 }
 0x3b0   : > { %2641 = vmatpush.bf16.msra.mxu3 %v4086_v44 }
 0x3b1   : > { %2600 = vmatpush.bf16.msra.mxu0 %v4061_v45 }
 0x3b2   : > { %2614 = vmatpush.bf16.msra.mxu1 %v4069_v46 }
 0x3b3   : > { %2628 = vmatpush.bf16.msra.mxu2 %v4077_v47 }
 0x3b4   : > { %2642 = vmatpush.bf16.msra.mxu3 %v4085_v48 }
 0x3b5   : > { %2601 = vmatpush.bf16.msra.mxu0 %v4060_v49 }
 0x3b6   : > { %2615 = vmatpush.bf16.msra.mxu1 %v4068_v51 }
 0x3b7   : > { %2629 = vmatpush.bf16.msra.mxu2 %v4076_v52 }
 0x3b8   : > { %2643 = vmatpush.bf16.msra.mxu3 %v4084_v53  ;;  %2602 = vmatmul.bf16.vlgmr.msra.gmra.mxu0 %v3697_v59 }
 0x3b9   : > { %2616 = vmatmul.bf16.vlgmr.msra.gmra.mxu1 %v3701_v60 }
 0x3ba   : > { %2630 = vmatmul.bf16.vlgmr.msra.gmra.mxu2 %v3705_v61 }
 0x3bb   : > { %2644 = vmatmul.bf16.vlgmr.msra.gmra.mxu3 %v3709_v62 }
 0x435   : > { %v2603_v0 = vpop.f32.mrf.mxu0 }
 0x436   : > { %v2604_v1 = vadd.f32 %v4337_v63, %v2603_v0  ;;  %v2617_v2 = vpop.f32.mrf.mxu1 }
 0x438   : > { %v2618_v3 = vadd.f32 %v2617_v2, %v2604_v1 }
 0x43d   : > { %v2631_v4 = vpop.f32.mrf.mxu2  ;;  %v2605_v7 = vpop.f32.mrf.mxu0 }
 0x43e   : > { %v2645_v5 = vpop.f32.mrf.mxu3  ;;  %v2632_v6 = vadd.f32 %v2631_v4, %v2618_v3  ;;  %v2606_v9 = vadd.f32 %v4337_v63, %v2605_v7  ;;  %v2619_v10 = vpop.f32.mrf.mxu1 }
 0x440   : > { %v2646_v8 = vadd.f32 %v2645_v5, %v2632_v6  ;;  %v2620_v11 = vadd.f32 %v2619_v10, %v2606_v9 }
 0x442   : > { %2650 = vst [vmem:[%s5353_s24] sm:$0xff] %v2646_v8 }
 0x445   : > { %v2633_v12 = vpop.f32.mrf.mxu2 }
 0x446   : > { %v2634_v13 = vadd.f32 %v2633_v12, %v2620_v11  ;;  %v2647_v14 = vpop.f32.mrf.mxu3 }
 0x448   : > { %v2648_v15 = vadd.f32 %v2647_v14, %v2634_v13 }
 0x44a   : > { %2651 = vst [vmem:[%s5353_s24 + $0x8] sm:$0xff] %v2648_v15 }
 0x44b PF: > { %s5793_s21 = sld [smem:[#allocation40_spill]]  ;;  %s2672_s25 = sshll.u32 %s5353_s24, 4  ;;  %s2673_s25 = int_to_ptr.vmem [resolvable:$true] %s2672_s25 }
 0x44c   : > { %s5794_s1 = sld [smem:[#allocation41_spill]]  ;;  %s2653_s4 = scalar_lea.sflag [#allocation8], %s753_s8 }
 0x44d   : > { %s5796_s2 = sld [smem:[#allocation46_spill]] }
 0x44e   : > { %s5797_s16 = sld [smem:[#allocation71_spill]] }
 0x451   : > { %s3839_s3 = sadd.s32 4294967288, %s5793_s21 }
 0x452   : > { %p2661_p13 = scmp.gt.s32.totalorder %s3839_s3, 0  ;;  %p3840_p3 = scmp.lt.s32.totalorder %s3839_s3, 2 }
 0x453   : > { %s4099_s15 = smul.u32 6, %s5794_s1  ;;  %p5799_p11 = scmp.ne.s32.totalorder %s5796_s2, 0 }
 0x454   : > { %s5854_s3 = smov (!%p2661_p13, %s3839_s3), 0  ;;  %s5798_s10 = smov %s5797_s16 }
 0x455   : > { %s5856_s3 = smov (!%p3840_p3, %s5854_s3), 2  ;;  %s4628_s5 = scalar_lea.hbm %s5798_s10, 96 }
 0x456   : > { %s2669_s13 = sadd.s32 %s4099_s15, %s5856_s3 }
 0x457   : > { %s3847_s29 = sshll.u32 %s2669_s13, 3 }
 0x458   : > { %s2671_s18 = scalar_lea.hbm %s5797_s16, %s3847_s29 }
 0x459   : > { %s2674_s12 = sshll.u32 %s2671_s18, 4  ;;  %s2675_s12 = int_to_ptr.hbm [resolvable:$true] %s2674_s12 }
 0x45a   : > { %s4622_s6 = sshra.s32 %s2675_s12, 4  ;;  %s4623_s6 = int_to_ptr.hbm [resolvable:$true] %s4622_s6 }
 0x45b   : > { %s4624_s22 = scalar_lea.hbm %s4623_s6, 16  ;;  %p4629_p1 = scmp.lt.s32.totalorder %s4623_s6, %s5798_s10 }
 0x45c   : > { %p4625_p6 = scmp.ne.s32.totalorder %s4623_s6, %s4624_s22  ;;  %p4630_p0 = scmp.lt.s32.totalorder %s4628_s5, %s4624_s22 }
 0x45e   : > { %p4626_p9 = pnand %p4625_p6, %p5799_p11  ;;  %p4631_p7 = por %p4630_p0, %p4629_p1 }
 0x460   : > { %p4627_p2 = pneg %p4626_p9 }
 0x462   : > { %p4632_p8 = pnand %p4631_p7, %p4627_p2 }
 0x464   : > { %4635 = shalt.err (!%p4632_p8)
}
 0x465   : > { %s4846_s8 = smov 128   ;;  %s4847_s17 = smov 384  }
 0x466   : > { %s4848_s7 = smov 8  }
 0x467   : > { %4122 = dma.vmem_to_hbm [thread:$0]  (%p5799_p11), %s2673_s25, 256, %s2675_s12, %s2653_s4, %s4846_s8, %s4847_s17, %s4848_s7  }
 0x468 PF: > { %s5800_s11 = sld [smem:[#allocation44_spill]] }
 0x469   : > { %s5801_s20 = sld [smem:[#allocation30_spill]] }
 0x46a   : > { %s5802_s21 = sld [smem:[#allocation47_spill]] }
 0x46e   : > { %p4162_p5 = scmp.ge.s32.totalorder %s5800_s11, 2 }
 0x46f   : > { %s2689_s1 = sand.u32 1, %s5801_s20  }
 0x470   : > { %p5803_p4 = scmp.ne.s32.totalorder %s5802_s21, 0  ;;  %s2690_s26 = scalar_lea.sflag [#allocation8], %s2689_s1 }
 0x472   : > { %p4154_p10 = pnand %p4162_p5, %p5803_p4 }
 0x474   : > { %p4155_p12 = pneg %p4154_p10 }
 0x476   : > { %4753 = dma.done.wait (%p4155_p12), %s2690_s26, 256  }
 0x477   : > { %4755 = vsyncadd (%p4155_p12), %s2690_s26, 4294967040  ;;  %s31_s11 = sadd.s32 1, %s5800_s11   ;;  %s5805_s17 = sld [smem:[#allocation31_spill]] }
 0x478   : > { %p5559_p13 = scmp.ge.s32.totalorder %s31_s11, 24   ;;  %s5806_s18 = sld [smem:[#allocation32_spill]] }
 0x479   : > { %s5807_s19 = sld [smem:[#allocation59_spill]]  ;;  %s5822_s26 = smov %s4798_s27 }
 0x47a   : > { %s5808_s20 = sld [smem:[#allocation34_spill]]  ;;  %s5823_s27 = smov %s4802_s28 }
 0x47b   : > { %s5809_s21 = sld [smem:[#allocation35_spill]] }
 0x47c   : > { %s5810_s22 = sld [smem:[#allocation58_spill]] }
 0x47d   : > { %s5811_s23 = sld [smem:[#allocation36_spill]] }
 0x47e   : > { %s5812_s24 = sld [smem:[#allocation37_spill]] }
 0x47f   : > { %s5813_s25 = sld [smem:[#allocation57_spill]] }
 0x480   : > { %s5814_s2 = sld [smem:[#allocation55_spill]] }
 0x481   : > { %s5815_s29 = sld [smem:[#allocation38_spill]] }
 0x482   : > { %s5816_s30 = sld [smem:[#allocation39_spill]] }
 0x483   : > { %s5817_s12 = sld [smem:[#allocation53_spill]]  ;;  %30 = sbr.rel (!%p5559_p13) target bundleno = 29 (0x1d), region = 207 }
 0x484   : > { %s5818_s13 = sld [smem:[#allocation42_spill]] }
 0x485   : > { %s5819_s14 = sld [smem:[#allocation43_spill]] }
 0x486   : > { %s5820_s15 = sld [smem:[#allocation50_spill]]  ;;  %s5824_s28 = smov %s5814_s2 }
 0x487   : > { %s5821_s16 = sld [smem:[#allocation52_spill]] }
 0x488   :  { %2696 = vsyncpa [#allocation7], 1 }
 0x489   :  { %2698 = vsyncpa [#allocation7 + $0x1], 1 }
 0x48a   :  { %2699 = vsyncpa [#allocation10], 1 }
 0x48b   :  { %2701 = vsyncpa [#allocation10 + $0x1], 1 }
 0x48c   :  { %2702 = vsyncpa [#allocation13], 1 }
 0x48d   :  { %2703 = vsyncpa [#allocation8], 1 }
 0x48e   :  { %2705 = vsyncpa [#allocation8 + $0x1], 1 }

</bundles_post_ra>
